<compile_context>
chip_gen: v7x
topology: tpu7x:2x2x1
jax: 0.10.0
libtpu: 0.0.40
codegen_flags: <defaults>
</compile_context>

<pallas_src>
import functools

import jax
import jax.numpy as jnp
from jax import lax
from jax.experimental import pallas as pl
from jax.experimental.pallas import tpu as pltpu

INIT_SCALE = 0.01

# MXU matmul dtype. float32 keeps strict agreement with the complex64 reference.
# On v6e/v7x set to jnp.bfloat16 for ~2x MXU throughput / half the weight bytes
# (and relax the tolerance check accordingly).
MXU_DTYPE = jnp.float32


def _dot(a, b):
    return jnp.dot(a.astype(MXU_DTYPE), b.astype(MXU_DTYPE),
                   preferred_element_type=jnp.float32)


def _dot_nt(a, b):
    # a[M, K] @ b[N, K]^T -> [M, N]
    return lax.dot_general(a.astype(MXU_DTYPE), b.astype(MXU_DTYPE),
                           (((1,), (1,)), ((), ())),
                           preferred_element_type=jnp.float32)


# ----------------------------- Pallas kernels ------------------------------

def retnet_layer_kernel(lgam_ref, xq_ref, xk_ref, cq_ref, sq_ref, ck_ref, sk_ref,
                        wq_ref, wk_ref, wv_ref, wg_ref, wo_ref, l1_ref, l2_ref,
                        out_ref, acc_r, acc_i, qr_s, qi_s,
                        *, num_heads, head_width, tq, tk):
    H, Dh = num_heads, head_width
    q_idx = pl.program_id(1)
    k_idx = pl.program_id(2)

    # ---- once per query tile: init accumulators, project + rotate Q ----------
    @pl.when(k_idx == 0)
    def _init():
        acc_r[...] = jnp.zeros_like(acc_r)
        acc_i[...] = jnp.zeros_like(acc_i)
        xr = xq_ref[0, :, :]                                    # [tq, W]
        xi = xq_ref[1, :, :]
        inv = lax.rsqrt(jnp.sum(xr * xr + xi * xi, axis=-1, keepdims=True))
        xn = jnp.concatenate([xr * inv, xi * inv], axis=0)      # [2tq, W] (re; im)
        q0 = _dot(xn, wq_ref[...])                              # W_Q pre-scaled 1/sqrt(Dh)
        q0r, q0i = q0[:tq], q0[tq:]
        c, s = cq_ref[...], sq_ref[...]
        qr_s[...] = q0r * c - q0i * s                           # Q *= Theta
        qi_s[...] = q0r * s + q0i * c

    # ---- one (causal) key tile ------------------------------------------------
    @pl.when(k_idx <= q_idx)
    def _body():
        xr = xk_ref[0, :, :]
        xi = xk_ref[1, :, :]
        inv = lax.rsqrt(jnp.sum(xr * xr + xi * xi, axis=-1, keepdims=True))
        xn = jnp.concatenate([xr * inv, xi * inv], axis=0)      # [2tk, W]
        k0 = _dot(xn, wk_ref[...])
        v0 = _dot(xn, wv_ref[...])
        k0r, k0i = k0[:tk], k0[tk:]
        vr, vi = v0[:tk], v0[tk:]
        c, s = ck_ref[...], sk_ref[...]
        kr = k0r * c + k0i * s                                  # K *= conj(Theta)
        ki = k0i * c - k0r * s

        qr = qr_s[...]
        qi = qi_s[...]

        # in-kernel causal decay D (no O(C^2) HBM matrix); clamp before exp.
        row = q_idx * tq + lax.broadcasted_iota(jnp.int32, (tq, tk), 0)
        col = k_idx * tk + lax.broadcasted_iota(jnp.int32, (tq, tk), 1)
        diff = row - col
        mask = diff >= 0
        expnt = jnp.maximum(diff, 0).astype(jnp.float32)

        ohr_parts, ohi_parts = [], []
        for h in range(H):                                      # static head loop
            sl = slice(h * Dh, (h + 1) * Dh)
            # real/imag packed into the contraction dim (K = 2*Dh and 2*tk)
            qp = jnp.concatenate([qr[:, sl], qi[:, sl]], axis=-1)        # [tq, 2Dh]
            ka = jnp.concatenate([kr[:, sl], -ki[:, sl]], axis=-1)       # [tk, 2Dh]
            kb = jnp.concatenate([ki[:, sl], kr[:, sl]], axis=-1)
            qk_r = _dot_nt(qp, ka)
            qk_i = _dot_nt(qp, kb)
            dmat = jnp.where(mask, jnp.exp(expnt * lgam_ref[h]), 0.0)
            p = jnp.concatenate([qk_r * dmat, qk_i * dmat], axis=-1)     # [tq, 2tk]
            va = jnp.concatenate([vr[:, sl], -vi[:, sl]], axis=0)        # [2tk, Dh]
            vb = jnp.concatenate([vi[:, sl], vr[:, sl]], axis=0)
            ohr_parts.append(_dot(p, va))
            ohi_parts.append(_dot(p, vb))
        acc_r[...] += jnp.concatenate(ohr_parts, axis=-1)
        acc_i[...] += jnp.concatenate(ohi_parts, axis=-1)

        # ---- epilogue on the last contributing key tile -----------------------
        @pl.when(k_idx == q_idx)
        def _epilogue():
            ohr = acc_r[...]
            ohi = acc_i[...]
            # per-head L2 normalization
            inv_parts = []
            for h in range(H):
                sl = slice(h * Dh, (h + 1) * Dh)
                a, b = ohr[:, sl], ohi[:, sl]
                ih = lax.rsqrt(jnp.sum(a * a + b * b, axis=-1, keepdims=True))
                inv_parts.append(jnp.broadcast_to(ih, (tq, Dh)))
            inv_full = jnp.concatenate(inv_parts, axis=-1)
            ohr = ohr * inv_full
            ohi = ohi * inv_full

            # gating: g = OH @ W_G ; OH *= g / (1 + exp(-2 g))  (complex)
            g = _dot(jnp.concatenate([ohr, ohi], axis=0), wg_ref[...])
            gr, gi = g[:tq], g[tq:]
            e = jnp.exp(-2.0 * gr)
            den_r = 1.0 + e * jnp.cos(2.0 * gi)
            den_i = -e * jnp.sin(2.0 * gi)
            invd = 1.0 / (den_r * den_r + den_i * den_i)
            sr = (gr * den_r + gi * den_i) * invd
            si = (gi * den_r - gr * den_i) * invd
            goh_r = ohr * sr - ohi * si
            goh_i = ohr * si + ohi * sr

            # output projection + residual
            proj = _dot(jnp.concatenate([goh_r, goh_i], axis=0), wo_ref[...])
            xq_pack = jnp.concatenate([xq_ref[0, :, :], xq_ref[1, :, :]], axis=0)
            latp = xq_pack + proj                               # [2tq, W]

            # MLP with pre-norm and complex SiLU: x / (1 + exp(-x))
            lr, li = latp[:tq], latp[tq:]
            inv2 = lax.rsqrt(jnp.sum(lr * lr + li * li, axis=-1, keepdims=True))
            latn = jnp.concatenate([lr * inv2, li * inv2], axis=0)
            y1 = _dot(latn, l1_ref[...])                        # [2tq, 4W]
            y1r, y1i = y1[:tq], y1[tq:]
            e2 = jnp.exp(-y1r)
            d2r = 1.0 + e2 * jnp.cos(y1i)
            d2i = -e2 * jnp.sin(y1i)
            inv_d2 = 1.0 / (d2r * d2r + d2i * d2i)
            zr = (y1r * d2r + y1i * d2i) * inv_d2
            zi = (y1i * d2r - y1r * d2i) * inv_d2
            outp = latp + _dot(jnp.concatenate([zr, zi], axis=0), l2_ref[...])
            out_ref[0, :, :] = outp[:tq]
            out_ref[1, :, :] = outp[tq:]


def classifier_kernel(lat_ref, w_ref, out_ref):
    # logits.real = latent.real @ classifier (classifier is real-valued)
    out_ref[...] = _dot(lat_ref[...], w_ref[...])


# ----------------------------- wrappers ------------------------------------

def _pick_tile(n, candidates=(256, 128, 64, 32, 16, 8)):
    for t in candidates:
        if n % t == 0:
            return t
    return n


def _block_diag(w):
    # [H, Dh, Dh] -> block-diagonal [H*Dh, H*Dh]
    H, Dh, _ = w.shape
    eye = jnp.eye(H, dtype=w.dtype)
    return jnp.einsum('hij,hg->higj', w, eye).reshape(H * Dh, H * Dh)


def retnet_layer_pallas(lat, p):
    """lat: packed [B, 2, C, W] (real, imag) -> same shape."""
    B, _, C, W = lat.shape
    H, Dh = p['theta'].shape
    tq = _pick_tile(C)
    nq = C // tq

    # Glue (functions of params / positions only, all O(C*W) or O(W^2)).
    pos = jnp.arange(C, dtype=jnp.float32)
    ang = pos[:, None] * p['theta'].reshape(1, W)               # [C, W]
    cosT = jnp.cos(ang)
    sinT = jnp.sin(ang)
    wq_bd = _block_diag(p['W_Q']) * (1.0 / float(Dh) ** 0.5)    # fold 1/qk_scale into Q
    wk_bd = _block_diag(p['W_K'])
    wv_bd = _block_diag(p['W_V'])
    wg = p['W_G'].reshape(W, W)
    wo = p['W_O'].reshape(W, W)
    log_gamma = jnp.log(p['gamma']).astype(jnp.float32)         # [H], scalars in SMEM

    kernel = functools.partial(retnet_layer_kernel,
                               num_heads=H, head_width=Dh, tq=tq, tk=tq)

    def wspec(shape):
        return pl.BlockSpec(shape, lambda b, q, k: (0,) * len(shape))

    lat_q_spec = pl.BlockSpec((None, 2, tq, W), lambda b, q, k: (b, 0, q, 0))
    # Clamp the key-tile index so skipped (k > q) steps do not issue new DMAs.
    lat_k_spec = pl.BlockSpec((None, 2, tq, W),
                              lambda b, q, k: (b, 0, jnp.minimum(k, q), 0))
    cs_q_spec = pl.BlockSpec((tq, W), lambda b, q, k: (q, 0))
    cs_k_spec = pl.BlockSpec((tq, W), lambda b, q, k: (jnp.minimum(k, q), 0))

    flops = int(2 * B * (2 * C) * W * W * 5 + 2 * B * (2 * C) * W * (4 * W) * 2
                + 2 * B * H * C * C * (2 * Dh) * 2 + 2 * B * H * C * (2 * C) * Dh * 2)
    transcendentals = int(B * C * 32 * W + B * H * C * C)
    bytes_accessed = int(4 * (4 * B * C * W + 2 * C * W + 13 * W * W + H))

    return pl.pallas_call(
        kernel,
        grid=(B, nq, nq),
        in_specs=[pl.BlockSpec(memory_space=pltpu.MemorySpace.SMEM),   # log_gamma
                  lat_q_spec, lat_k_spec,
                  cs_q_spec, cs_q_spec, cs_k_spec, cs_k_spec,
                  wspec((W, W)), wspec((W, W)), wspec((W, W)),
                  wspec((W, W)), wspec((W, W)),
                  wspec((W, 4 * W)), wspec((4 * W, W))],
        out_specs=pl.BlockSpec((None, 2, tq, W), lambda b, q, k: (b, 0, q, 0)),
        out_shape=jax.ShapeDtypeStruct((B, 2, C, W), jnp.float32),
        scratch_shapes=[pltpu.VMEM((tq, W), jnp.float32),   # acc real
                        pltpu.VMEM((tq, W), jnp.float32),   # acc imag
                        pltpu.VMEM((tq, W), jnp.float32),   # cached rotated Q real
                        pltpu.VMEM((tq, W), jnp.float32)],  # cached rotated Q imag
        compiler_params=pltpu.CompilerParams(
            dimension_semantics=("parallel", "parallel", "arbitrary"),
            vmem_limit_bytes=64 * 1024 * 1024),
        cost_estimate=pl.CostEstimate(flops=flops,
                                      transcendentals=transcendentals,
                                      bytes_accessed=bytes_accessed),
    )(log_gamma, lat, lat, cosT, sinT, cosT, sinT,
      wq_bd, wk_bd, wv_bd, wg, wo, p['linear1'], p['linear2'])


def classifier_pallas(lat, classifier):
    B, _, C, W = lat.shape
    V = classifier.shape[1]
    tv = _pick_tile(V, candidates=(512, 256, 128))
    nv = V // tv
    return pl.pallas_call(
        classifier_kernel,
        grid=(B, nv),
        in_specs=[pl.BlockSpec((None, None, C, W), lambda b, v: (b, 0, 0, 0)),
                  pl.BlockSpec((W, tv), lambda b, v: (0, v))],
        out_specs=pl.BlockSpec((None, C, tv), lambda b, v: (b, 0, v)),
        out_shape=jax.ShapeDtypeStruct((B, C, V), jnp.float32),
        compiler_params=pltpu.CompilerParams(
            dimension_semantics=("parallel", "parallel")),
        cost_estimate=pl.CostEstimate(flops=int(2 * B * C * W * V),
                                      transcendentals=0,
                                      bytes_accessed=int(4 * (B * C * W + W * V + B * C * V))),
    )(lat, classifier)


@jax.jit
def retnet_forward(tokens, params):
    emb = params['embedding'][tokens]                       # embedding lookup (glue)
    lat = jnp.stack([emb, jnp.zeros_like(emb)], axis=1)     # packed [B, 2, C, W]
    for p in params['layers']:
        lat = retnet_layer_pallas(lat, p)
    return classifier_pallas(lat, params['classifier'])


# ----------------------------- reference (plain JAX, complex64) -------------

def _retention_ref(xn, p):
    B, C, W = xn.shape
    H, Dh = p['theta'].shape
    pos = jnp.arange(C, dtype=jnp.float32)
    power = pos[:, None] - pos[None, :]
    D = jnp.where(power[None] >= 0, p['gamma'][:, None, None] ** power[None], 0.0)
    Theta = jnp.exp(1j * pos[None, :, None] * p['theta'][:, None, :]).astype(jnp.complex64)
    xh = xn.reshape(B, C, H, Dh)
    Q = jnp.einsum('hij,bchi->bhcj', p['W_Q'].astype(jnp.complex64), xh) * Theta
    K = jnp.einsum('hij,bchi->bhcj', p['W_K'].astype(jnp.complex64), xh) * jnp.conj(Theta)
    V = jnp.einsum('hij,bchi->bhcj', p['W_V'].astype(jnp.complex64), xh)
    QK = jnp.einsum('bhci,bhdi->bhcd', Q, K) / jnp.float32(Dh ** 0.5)
    QKD = QK * D[None].astype(jnp.complex64)
    oh = jnp.einsum('bhcd,bhdi->bchi', QKD, V)
    nrm = jnp.sqrt(jnp.sum(jnp.abs(oh) ** 2, axis=-1, keepdims=True))
    oh = oh / nrm
    g = jnp.einsum('bchi,hijk->bcjk', oh, p['W_G'].astype(jnp.complex64))
    oh = oh * g / (1 + jnp.exp(-2 * g))
    return jnp.einsum('bchi,hik->bck', oh, p['W_O'].astype(jnp.complex64))


def _mlp_ref(x, p):
    x = x @ p['linear1'].astype(jnp.complex64)
    x = x / (1 + jnp.exp(-x))
    return x @ p['linear2'].astype(jnp.complex64)


def retnet_forward_ref(tokens, params):
    lat = params['embedding'][tokens].astype(jnp.complex64)
    for p in params['layers']:
        nrm = jnp.sqrt(jnp.sum(jnp.abs(lat) ** 2, axis=-1, keepdims=True))
        lat = lat + _retention_ref(lat / nrm, p)
        nrm = jnp.sqrt(jnp.sum(jnp.abs(lat) ** 2, axis=-1, keepdims=True))
        lat = lat + _mlp_ref(lat / nrm, p)
    return (lat @ params['classifier'].astype(jnp.complex64)).real


# ----------------------------- init -----------------------------------------

def init_params(key, vocab, head_width, num_heads, num_layers):
    W = head_width * num_heads
    keys = jax.random.split(key, 2 + num_layers)
    if num_heads == 1:
        gamma = jnp.array([1 - 10.0 ** (-6)], jnp.float32)
    else:
        log_range = jnp.arange(num_heads, dtype=jnp.float32) / (num_heads - 1)
        inv_pow = -6.0 + (-2.0 - (-6.0)) * log_range
        gamma = (1.0 - 10.0 ** inv_pow).astype(jnp.float32)
    params = {
        'embedding': jax.random.normal(keys[0], (vocab, W), jnp.float32),
        'classifier': jax.random.normal(keys[1], (W, vocab), jnp.float32) * INIT_SCALE,
        'layers': [],
    }
    for i in range(num_layers):
        lk = jax.random.split(keys[2 + i], 8)
        params['layers'].append({
            'W_Q': jax.random.normal(lk[0], (num_heads, head_width, head_width), jnp.float32) * INIT_SCALE,
            'W_K': jax.random.normal(lk[1], (num_heads, head_width, head_width), jnp.float32) * INIT_SCALE,
            'W_V': jax.random.normal(lk[2], (num_heads, head_width, head_width), jnp.float32) * INIT_SCALE,
            'theta': jax.random.normal(lk[3], (num_heads, head_width), jnp.float32) * INIT_SCALE,
            'gamma': gamma,
            'W_O': jax.random.normal(lk[4], (num_heads, head_width, W), jnp.float32) * INIT_SCALE,
            'W_G': jax.random.normal(lk[5], (num_heads, head_width, num_heads, head_width), jnp.float32) * INIT_SCALE,
            'linear1': jax.random.normal(lk[6], (W, 4 * W), jnp.float32) * INIT_SCALE,
            'linear2': jax.random.normal(lk[7], (4 * W, W), jnp.float32) * INIT_SCALE,
        })
    return params


# ----------------------------- main ------------------------------------------

if __name__ == "__main__":
    vocab, head_width, num_heads, num_layers = 50, 16, 2, 2
    B, C = 2, 8
    key = jax.random.PRNGKey(0)
    pkey, tkey = jax.random.split(key)
    params = init_params(pkey, vocab, head_width, num_heads, num_layers)
    tokens = jax.random.randint(tkey, (B, C), 0, vocab, dtype=jnp.int32)

    logits = retnet_forward(tokens, params)
    logits = jax.block_until_ready(logits)

    ref = retnet_forward_ref(tokens, params)
    assert logits.shape == (B, C, vocab)
    assert bool(jnp.all(jnp.isfinite(logits)))
    max_err = float(jnp.max(jnp.abs(logits - ref)))
    assert jnp.allclose(logits, ref, rtol=1e-3, atol=5e-4), f"max abs err {max_err}"
    print("KERNEL_OK")
</pallas_src>

<mosaic_0001>
module attributes {stable_mosaic.version = 11 : i64} {
  func.func @classifier_kernel(%arg0: i32, %arg1: i32, %arg2: memref<1x1x8x32xf32, #tpu.memory_space<vmem>>, %arg3: memref<32x50xf32, #tpu.memory_space<vmem>>, %arg4: memref<1x8x50xf32, #tpu.memory_space<vmem>>) attributes {dimension_semantics = [#tpu.dimension_semantics<parallel>, #tpu.dimension_semantics<parallel>], iteration_bounds = array<i64: 2, 1>, scalar_prefetch = 0 : i64, scratch_operands = 0 : i64, tpu.core_type = #tpu.core_type<tc>, window_params = [{transform_indices = @transform_0, window_bounds = array<i64: 1, 1, 8, 32>}, {transform_indices = @transform_1, window_bounds = array<i64: 32, 50>}, {transform_indices = @transform_2, window_bounds = array<i64: 1, 8, 50>}]} {
    %c0 = arith.constant 0 : index
    %c0_0 = arith.constant 0 : index
    %c0_1 = arith.constant 0 : index
    %c0_2 = arith.constant 0 : index
    %0 = vector.load %arg2[%c0, %c0_0, %c0_1, %c0_2] : memref<1x1x8x32xf32, #tpu.memory_space<vmem>>, vector<1x1x8x32xf32>
    %1 = vector.shape_cast %0 : vector<1x1x8x32xf32> to vector<8x32xf32>
    %c0_3 = arith.constant 0 : index
    %c0_4 = arith.constant 0 : index
    %2 = vector.load %arg3[%c0_3, %c0_4] : memref<32x50xf32, #tpu.memory_space<vmem>>, vector<32x50xf32>
    %cst = arith.constant dense<0.000000e+00> : vector<8x50xf32>
    %3 = tpu.matmul %1, %2, %cst {dimension_numbers = #tpu.dot_dimension_numbers<[1], [0], [0], [1], [0, 0, 1, 1], [], []>} : vector<8x32xf32>, vector<32x50xf32>, vector<8x50xf32> -> vector<8x50xf32>
    %c0_5 = arith.constant 0 : index
    %c0_6 = arith.constant 0 : index
    %c0_7 = arith.constant 0 : index
    %4 = vector.load %arg4[%c0_5, %c0_6, %c0_7] : memref<1x8x50xf32, #tpu.memory_space<vmem>>, vector<1x8x50xf32>
    %5 = vector.shape_cast %4 : vector<1x8x50xf32> to vector<8x50xf32>
    %6 = vector.shape_cast %3 : vector<8x50xf32> to vector<1x8x50xf32>
    tpu.vector_store %arg4[%c0_5, %c0_6, %c0_7], %6 {strides = array<i32>} : memref<1x8x50xf32, #tpu.memory_space<vmem>>, vector<1x8x50xf32>,
    return
  }
  func.func @transform_0(%arg0: i32, %arg1: i32) -> (i32, i32, i32, i32) {
    %c0_i32 = arith.constant 0 : i32
    %c0_i32_0 = arith.constant 0 : i32
    %c0_i32_1 = arith.constant 0 : i32
    %c0_i32_2 = arith.constant 0 : i32
    return %arg0, %c0_i32, %c0_i32_0, %c0_i32_1 : i32, i32, i32, i32
  }
  func.func @transform_1(%arg0: i32, %arg1: i32) -> (i32, i32) {
    %c0_i32 = arith.constant 0 : i32
    %c0_i32_0 = arith.constant 0 : i32
    return %c0_i32, %arg1 : i32, i32
  }
  func.func @transform_2(%arg0: i32, %arg1: i32) -> (i32, i32, i32) {
    %c0_i32 = arith.constant 0 : i32
    %c0_i32_0 = arith.constant 0 : i32
    return %arg0, %c0_i32, %arg1 : i32, i32, i32
  }
}

module attributes {stable_mosaic.version = 11 : i64} {
  func.func @retnet_layer_kernel(%arg0: i32, %arg1: i32, %arg2: i32, %arg3: memref<2xf32, #tpu.memory_space<smem>>, %arg4: memref<1x2x8x32xf32, #tpu.memory_space<vmem>>, %arg5: memref<1x2x8x32xf32, #tpu.memory_space<vmem>>, %arg6: memref<8x32xf32, #tpu.memory_space<vmem>>, %arg7: memref<8x32xf32, #tpu.memory_space<vmem>>, %arg8: memref<8x32xf32, #tpu.memory_space<vmem>>, %arg9: memref<8x32xf32, #tpu.memory_space<vmem>>, %arg10: memref<32x32xf32, #tpu.memory_space<vmem>>, %arg11: memref<32x32xf32, #tpu.memory_space<vmem>>, %arg12: memref<32x32xf32, #tpu.memory_space<vmem>>, %arg13: memref<32x32xf32, #tpu.memory_space<vmem>>, %arg14: memref<32x32xf32, #tpu.memory_space<vmem>>, %arg15: memref<32x128xf32, #tpu.memory_space<vmem>>, %arg16: memref<128x32xf32, #tpu.memory_space<vmem>>, %arg17: memref<1x2x8x32xf32, #tpu.memory_space<vmem>>, %arg18: memref<8x32xf32, #tpu.memory_space<vmem>>, %arg19: memref<8x32xf32, #tpu.memory_space<vmem>>, %arg20: memref<8x32xf32, #tpu.memory_space<vmem>>, %arg21: memref<8x32xf32, #tpu.memory_space<vmem>>) attributes {dimension_semantics = [#tpu.dimension_semantics<parallel>, #tpu.dimension_semantics<parallel>, #tpu.dimension_semantics<arbitrary>], iteration_bounds = array<i64: 2, 1, 1>, scalar_prefetch = 0 : i64, scratch_operands = 4 : i64, tpu.core_type = #tpu.core_type<tc>, window_params = [{transform_indices = @transform_0, window_bounds = array<i64: 2>}, {transform_indices = @transform_1, window_bounds = array<i64: 1, 2, 8, 32>}, {transform_indices = @transform_2, window_bounds = array<i64: 1, 2, 8, 32>}, {transform_indices = @transform_3, window_bounds = array<i64: 8, 32>}, {transform_indices = @transform_4, window_bounds = array<i64: 8, 32>}, {transform_indices = @transform_5, window_bounds = array<i64: 8, 32>}, {transform_indices = @transform_6, window_bounds = array<i64: 8, 32>}, {pipeline_mode = #tpu.pipeline_mode<synchronous>, transform_indices = @transform_7, window_bounds = array<i64: 32, 32>}, {pipeline_mode = #tpu.pipeline_mode<synchronous>, transform_indices = @transform_8, window_bounds = array<i64: 32, 32>}, {pipeline_mode = #tpu.pipeline_mode<synchronous>, transform_indices = @transform_9, window_bounds = array<i64: 32, 32>}, {pipeline_mode = #tpu.pipeline_mode<synchronous>, transform_indices = @transform_10, window_bounds = array<i64: 32, 32>}, {pipeline_mode = #tpu.pipeline_mode<synchronous>, transform_indices = @transform_11, window_bounds = array<i64: 32, 32>}, {pipeline_mode = #tpu.pipeline_mode<synchronous>, transform_indices = @transform_12, window_bounds = array<i64: 32, 128>}, {pipeline_mode = #tpu.pipeline_mode<synchronous>, transform_indices = @transform_13, window_bounds = array<i64: 128, 32>}, {transform_indices = @transform_14, window_bounds = array<i64: 1, 2, 8, 32>}]} {
    %c0_i32 = arith.constant 0 : i32
    %0 = arith.cmpi eq, %arg2, %c0_i32 : i32
    %1 = arith.extui %0 : i1 to i32
    %c0_i32_0 = arith.constant 0 : i32
    %2 = arith.cmpi ne, %1, %c0_i32_0 : i32
    scf.if %2 {
      %cst = arith.constant 0.000000e+00 : f32
      %6 = vector.broadcast %cst : f32 to vector<8x32xf32>
      %c0 = arith.constant 0 : index
      %c0_2 = arith.constant 0 : index
      %7 = vector.load %arg18[%c0, %c0_2] : memref<8x32xf32, #tpu.memory_space<vmem>>, vector<8x32xf32>
      tpu.vector_store %arg18[%c0, %c0_2], %6 {strides = array<i32>} : memref<8x32xf32, #tpu.memory_space<vmem>>, vector<8x32xf32>,
      %cst_3 = arith.constant 0.000000e+00 : f32
      %8 = vector.broadcast %cst_3 : f32 to vector<8x32xf32>
      %c0_4 = arith.constant 0 : index
      %c0_5 = arith.constant 0 : index
      %9 = vector.load %arg19[%c0_4, %c0_5] : memref<8x32xf32, #tpu.memory_space<vmem>>, vector<8x32xf32>
      tpu.vector_store %arg19[%c0_4, %c0_5], %8 {strides = array<i32>} : memref<8x32xf32, #tpu.memory_space<vmem>>, vector<8x32xf32>,
      %c0_6 = arith.constant 0 : index
      %c0_7 = arith.constant 0 : index
      %c0_8 = arith.constant 0 : index
      %c0_9 = arith.constant 0 : index
      %10 = vector.load %arg4[%c0_6, %c0_7, %c0_8, %c0_9] : memref<1x2x8x32xf32, #tpu.memory_space<vmem>>, vector<1x1x8x32xf32>
      %11 = vector.shape_cast %10 : vector<1x1x8x32xf32> to vector<8x32xf32>
      %c0_10 = arith.constant 0 : index
      %c1 = arith.constant 1 : index
      %c0_11 = arith.constant 0 : index
      %c0_12 = arith.constant 0 : index
      %12 = vector.load %arg4[%c0_10, %c1, %c0_11, %c0_12] : memref<1x2x8x32xf32, #tpu.memory_space<vmem>>, vector<1x1x8x32xf32>
      %13 = vector.shape_cast %12 : vector<1x1x8x32xf32> to vector<8x32xf32>
      %14 = arith.mulf %11, %11 : vector<8x32xf32>
      %15 = arith.mulf %13, %13 : vector<8x32xf32>
      %16 = arith.addf %14, %15 : vector<8x32xf32>
      %cst_13 = arith.constant dense<0.000000e+00> : vector<8xf32>
      %17 = vector.multi_reduction <add>, %16, %cst_13 [1] : vector<8x32xf32> to vector<8xf32>
      %18 = vector.shape_cast %17 : vector<8xf32> to vector<8x1xf32>
      %19 = math.rsqrt %18 : vector<8x1xf32>
      %20 = vector.broadcast %19 : vector<8x1xf32> to vector<8x32xf32>
      %21 = arith.mulf %11, %20 : vector<8x32xf32>
      %22 = vector.broadcast %19 : vector<8x1xf32> to vector<8x32xf32>
      %23 = arith.mulf %13, %22 : vector<8x32xf32>
      %24 = tpu.concatenate %21, %23 in 0 : vector<8x32xf32>, vector<8x32xf32> -> vector<16x32xf32>
      %c0_14 = arith.constant 0 : index
      %c0_15 = arith.constant 0 : index
      %25 = vector.load %arg10[%c0_14, %c0_15] : memref<32x32xf32, #tpu.memory_space<vmem>>, vector<32x32xf32>
      %cst_16 = arith.constant dense<0.000000e+00> : vector<16x32xf32>
      %26 = tpu.matmul %24, %25, %cst_16 {dimension_numbers = #tpu.dot_dimension_numbers<[1], [0], [0], [1], [0, 0, 1, 1], [], []>} : vector<16x32xf32>, vector<32x32xf32>, vector<16x32xf32> -> vector<16x32xf32>
      %27 = vector.extract_strided_slice %26 {offsets = [0, 0], sizes = [8, 32], strides = [1, 1]} : vector<16x32xf32> to vector<8x32xf32>
      %28 = vector.extract_strided_slice %26 {offsets = [8, 0], sizes = [8, 32], strides = [1, 1]} : vector<16x32xf32> to vector<8x32xf32>
      %c0_17 = arith.constant 0 : index
      %c0_18 = arith.constant 0 : index
      %29 = vector.load %arg6[%c0_17, %c0_18] : memref<8x32xf32, #tpu.memory_space<vmem>>, vector<8x32xf32>
      %c0_19 = arith.constant 0 : index
      %c0_20 = arith.constant 0 : index
      %30 = vector.load %arg7[%c0_19, %c0_20] : memref<8x32xf32, #tpu.memory_space<vmem>>, vector<8x32xf32>
      %31 = arith.mulf %27, %29 : vector<8x32xf32>
      %32 = arith.mulf %28, %30 : vector<8x32xf32>
      %33 = arith.subf %31, %32 : vector<8x32xf32>
      %c0_21 = arith.constant 0 : index
      %c0_22 = arith.constant 0 : index
      %34 = vector.load %arg20[%c0_21, %c0_22] : memref<8x32xf32, #tpu.memory_space<vmem>>, vector<8x32xf32>
      tpu.vector_store %arg20[%c0_21, %c0_22], %33 {strides = array<i32>} : memref<8x32xf32, #tpu.memory_space<vmem>>, vector<8x32xf32>,
      %35 = arith.mulf %27, %30 : vector<8x32xf32>
      %36 = arith.mulf %28, %29 : vector<8x32xf32>
      %37 = arith.addf %35, %36 : vector<8x32xf32>
      %c0_23 = arith.constant 0 : index
      %c0_24 = arith.constant 0 : index
      %38 = vector.load %arg21[%c0_23, %c0_24] : memref<8x32xf32, #tpu.memory_space<vmem>>, vector<8x32xf32>
      tpu.vector_store %arg21[%c0_23, %c0_24], %37 {strides = array<i32>} : memref<8x32xf32, #tpu.memory_space<vmem>>, vector<8x32xf32>,
    } else {
    }
    %3 = arith.cmpi sle, %arg2, %arg1 : i32
    %4 = arith.extui %3 : i1 to i32
    %c0_i32_1 = arith.constant 0 : i32
    %5 = arith.cmpi ne, %4, %c0_i32_1 : i32
    scf.if %5 {
      %c0 = arith.constant 0 : index
      %c0_2 = arith.constant 0 : index
      %c0_3 = arith.constant 0 : index
      %c0_4 = arith.constant 0 : index
      %6 = vector.load %arg5[%c0, %c0_2, %c0_3, %c0_4] : memref<1x2x8x32xf32, #tpu.memory_space<vmem>>, vector<1x1x8x32xf32>
      %7 = vector.shape_cast %6 : vector<1x1x8x32xf32> to vector<8x32xf32>
      %c0_5 = arith.constant 0 : index
      %c1 = arith.constant 1 : index
      %c0_6 = arith.constant 0 : index
      %c0_7 = arith.constant 0 : index
      %8 = vector.load %arg5[%c0_5, %c1, %c0_6, %c0_7] : memref<1x2x8x32xf32, #tpu.memory_space<vmem>>, vector<1x1x8x32xf32>
      %9 = vector.shape_cast %8 : vector<1x1x8x32xf32> to vector<8x32xf32>
      %10 = arith.mulf %7, %7 : vector<8x32xf32>
      %11 = arith.mulf %9, %9 : vector<8x32xf32>
      %12 = arith.addf %10, %11 : vector<8x32xf32>
      %cst = arith.constant dense<0.000000e+00> : vector<8xf32>
      %13 = vector.multi_reduction <add>, %12, %cst [1] : vector<8x32xf32> to vector<8xf32>
      %14 = vector.shape_cast %13 : vector<8xf32> to vector<8x1xf32>
      %15 = math.rsqrt %14 : vector<8x1xf32>
      %16 = vector.broadcast %15 : vector<8x1xf32> to vector<8x32xf32>
      %17 = arith.mulf %7, %16 : vector<8x32xf32>
      %18 = vector.broadcast %15 : vector<8x1xf32> to vector<8x32xf32>
      %19 = arith.mulf %9, %18 : vector<8x32xf32>
      %20 = tpu.concatenate %17, %19 in 0 : vector<8x32xf32>, vector<8x32xf32> -> vector<16x32xf32>
      %c0_8 = arith.constant 0 : index
      %c0_9 = arith.constant 0 : index
      %21 = vector.load %arg11[%c0_8, %c0_9] : memref<32x32xf32, #tpu.memory_space<vmem>>, vector<32x32xf32>
      %cst_10 = arith.constant dense<0.000000e+00> : vector<16x32xf32>
      %22 = tpu.matmul %20, %21, %cst_10 {dimension_numbers = #tpu.dot_dimension_numbers<[1], [0], [0], [1], [0, 0, 1, 1], [], []>} : vector<16x32xf32>, vector<32x32xf32>, vector<16x32xf32> -> vector<16x32xf32>
      %c0_11 = arith.constant 0 : index
      %c0_12 = arith.constant 0 : index
      %23 = vector.load %arg12[%c0_11, %c0_12] : memref<32x32xf32, #tpu.memory_space<vmem>>, vector<32x32xf32>
      %cst_13 = arith.constant dense<0.000000e+00> : vector<16x32xf32>
      %24 = tpu.matmul %20, %23, %cst_13 {dimension_numbers = #tpu.dot_dimension_numbers<[1], [0], [0], [1], [0, 0, 1, 1], [], []>} : vector<16x32xf32>, vector<32x32xf32>, vector<16x32xf32> -> vector<16x32xf32>
      %25 = vector.extract_strided_slice %22 {offsets = [0, 0], sizes = [8, 32], strides = [1, 1]} : vector<16x32xf32> to vector<8x32xf32>
      %26 = vector.extract_strided_slice %22 {offsets = [8, 0], sizes = [8, 32], strides = [1, 1]} : vector<16x32xf32> to vector<8x32xf32>
      %27 = vector.extract_strided_slice %24 {offsets = [0, 0], sizes = [8, 32], strides = [1, 1]} : vector<16x32xf32> to vector<8x32xf32>
      %28 = vector.extract_strided_slice %24 {offsets = [8, 0], sizes = [8, 32], strides = [1, 1]} : vector<16x32xf32> to vector<8x32xf32>
      %c0_14 = arith.constant 0 : index
      %c0_15 = arith.constant 0 : index
      %29 = vector.load %arg8[%c0_14, %c0_15] : memref<8x32xf32, #tpu.memory_space<vmem>>, vector<8x32xf32>
      %c0_16 = arith.constant 0 : index
      %c0_17 = arith.constant 0 : index
      %30 = vector.load %arg9[%c0_16, %c0_17] : memref<8x32xf32, #tpu.memory_space<vmem>>, vector<8x32xf32>
      %31 = arith.mulf %25, %29 : vector<8x32xf32>
      %32 = arith.mulf %26, %30 : vector<8x32xf32>
      %33 = arith.addf %31, %32 : vector<8x32xf32>
      %34 = arith.mulf %26, %29 : vector<8x32xf32>
      %35 = arith.mulf %25, %30 : vector<8x32xf32>
      %36 = arith.subf %34, %35 : vector<8x32xf32>
      %c0_18 = arith.constant 0 : index
      %c0_19 = arith.constant 0 : index
      %37 = vector.load %arg20[%c0_18, %c0_19] : memref<8x32xf32, #tpu.memory_space<vmem>>, vector<8x32xf32>
      %c0_20 = arith.constant 0 : index
      %c0_21 = arith.constant 0 : index
      %38 = vector.load %arg21[%c0_20, %c0_21] : memref<8x32xf32, #tpu.memory_space<vmem>>, vector<8x32xf32>
      %c8_i32 = arith.constant 8 : i32
      %39 = arith.muli %arg1, %c8_i32 : i32
      %40 = tpu.iota {dimensions = array<i32: 0>} : vector<8x8xi32>
      %41 = vector.broadcast %39 : i32 to vector<8x8xi32>
      %42 = arith.addi %41, %40 : vector<8x8xi32>
      %c8_i32_22 = arith.constant 8 : i32
      %43 = arith.muli %arg2, %c8_i32_22 : i32
      %44 = tpu.iota {dimensions = array<i32: 1>} : vector<8x8xi32>
      %45 = vector.broadcast %43 : i32 to vector<8x8xi32>
      %46 = arith.addi %45, %44 : vector<8x8xi32>
      %47 = arith.subi %42, %46 : vector<8x8xi32>
      %c0_i32_23 = arith.constant 0 : i32
      %48 = vector.broadcast %c0_i32_23 : i32 to vector<8x8xi32>
      %49 = arith.cmpi sge, %47, %48 : vector<8x8xi32>
      %c0_i32_24 = arith.constant 0 : i32
      %50 = vector.broadcast %c0_i32_24 : i32 to vector<8x8xi32>
      %51 = arith.maxsi %47, %50 : vector<8x8xi32>
      %52 = arith.sitofp %51 : vector<8x8xi32> to vector<8x8xf32>
      %53 = vector.extract_strided_slice %37 {offsets = [0, 0], sizes = [8, 16], strides = [1, 1]} : vector<8x32xf32> to vector<8x16xf32>
      %54 = vector.extract_strided_slice %38 {offsets = [0, 0], sizes = [8, 16], strides = [1, 1]} : vector<8x32xf32> to vector<8x16xf32>
      %55 = tpu.concatenate %53, %54 in 1 : vector<8x16xf32>, vector<8x16xf32> -> vector<8x32xf32>
      %56 = vector.extract_strided_slice %33 {offsets = [0, 0], sizes = [8, 16], strides = [1, 1]} : vector<8x32xf32> to vector<8x16xf32>
      %57 = vector.extract_strided_slice %36 {offsets = [0, 0], sizes = [8, 16], strides = [1, 1]} : vector<8x32xf32> to vector<8x16xf32>
      %cst_25 = arith.constant 0.000000e+00 : f32
      %58 = vector.broadcast %cst_25 : f32 to vector<8x16xf32>
      %59 = arith.subf %58, %57 : vector<8x16xf32>
      %60 = tpu.concatenate %56, %59 in 1 : vector<8x16xf32>, vector<8x16xf32> -> vector<8x32xf32>
      %61 = vector.extract_strided_slice %36 {offsets = [0, 0], sizes = [8, 16], strides = [1, 1]} : vector<8x32xf32> to vector<8x16xf32>
      %62 = vector.extract_strided_slice %33 {offsets = [0, 0], sizes = [8, 16], strides = [1, 1]} : vector<8x32xf32> to vector<8x16xf32>
      %63 = tpu.concatenate %61, %62 in 1 : vector<8x16xf32>, vector<8x16xf32> -> vector<8x32xf32>
      %cst_26 = arith.constant dense<0.000000e+00> : vector<8x8xf32>
      %64 = tpu.matmul %55, %60, %cst_26 {dimension_numbers = #tpu.dot_dimension_numbers<[1], [1], [0], [0], [0, 0, 1, 0], [], []>} : vector<8x32xf32>, vector<8x32xf32>, vector<8x8xf32> -> vector<8x8xf32>
      %cst_27 = arith.constant dense<0.000000e+00> : vector<8x8xf32>
      %65 = tpu.matmul %55, %63, %cst_27 {dimension_numbers = #tpu.dot_dimension_numbers<[1], [1], [0], [0], [0, 0, 1, 0], [], []>} : vector<8x32xf32>, vector<8x32xf32>, vector<8x8xf32> -> vector<8x8xf32>
      %c0_28 = arith.constant 0 : index
      %66 = memref.load %arg3[%c0_28] : memref<2xf32, #tpu.memory_space<smem>>
      %67 = vector.broadcast %66 : f32 to vector<8x8xf32>
      %68 = arith.mulf %52, %67 : vector<8x8xf32>
      %69 = math.exp %68 : vector<8x8xf32>
      %cst_29 = arith.constant 0.000000e+00 : f32
      %70 = vector.broadcast %cst_29 : f32 to vector<8x8xf32>
      %71 = arith.select %49, %69, %70 : vector<8x8xi1>, vector<8x8xf32>
      %72 = arith.mulf %64, %71 : vector<8x8xf32>
      %73 = arith.mulf %65, %71 : vector<8x8xf32>
      %74 = tpu.concatenate %72, %73 in 1 : vector<8x8xf32>, vector<8x8xf32> -> vector<8x16xf32>
      %75 = vector.extract_strided_slice %27 {offsets = [0, 0], sizes = [8, 16], strides = [1, 1]} : vector<8x32xf32> to vector<8x16xf32>
      %76 = vector.extract_strided_slice %28 {offsets = [0, 0], sizes = [8, 16], strides = [1, 1]} : vector<8x32xf32> to vector<8x16xf32>
      %cst_30 = arith.constant 0.000000e+00 : f32
      %77 = vector.broadcast %cst_30 : f32 to vector<8x16xf32>
      %78 = arith.subf %77, %76 : vector<8x16xf32>
      %79 = tpu.concatenate %75, %78 in 0 : vector<8x16xf32>, vector<8x16xf32> -> vector<16x16xf32>
      %80 = vector.extract_strided_slice %28 {offsets = [0, 0], sizes = [8, 16], strides = [1, 1]} : vector<8x32xf32> to vector<8x16xf32>
      %81 = vector.extract_strided_slice %27 {offsets = [0, 0], sizes = [8, 16], strides = [1, 1]} : vector<8x32xf32> to vector<8x16xf32>
      %82 = tpu.concatenate %80, %81 in 0 : vector<8x16xf32>, vector<8x16xf32> -> vector<16x16xf32>
      %cst_31 = arith.constant dense<0.000000e+00> : vector<8x16xf32>
      %83 = tpu.matmul %74, %79, %cst_31 {dimension_numbers = #tpu.dot_dimension_numbers<[1], [0], [0], [1], [0, 0, 1, 1], [], []>} : vector<8x16xf32>, vector<16x16xf32>, vector<8x16xf32> -> vector<8x16xf32>
      %cst_32 = arith.constant dense<0.000000e+00> : vector<8x16xf32>
      %84 = tpu.matmul %74, %82, %cst_32 {dimension_numbers = #tpu.dot_dimension_numbers<[1], [0], [0], [1], [0, 0, 1, 1], [], []>} : vector<8x16xf32>, vector<16x16xf32>, vector<8x16xf32> -> vector<8x16xf32>
      %85 = vector.extract_strided_slice %37 {offsets = [0, 16], sizes = [8, 16], strides = [1, 1]} : vector<8x32xf32> to vector<8x16xf32>
      %86 = vector.extract_strided_slice %38 {offsets = [0, 16], sizes = [8, 16], strides = [1, 1]} : vector<8x32xf32> to vector<8x16xf32>
      %87 = tpu.concatenate %85, %86 in 1 : vector<8x16xf32>, vector<8x16xf32> -> vector<8x32xf32>
      %88 = vector.extract_strided_slice %33 {offsets = [0, 16], sizes = [8, 16], strides = [1, 1]} : vector<8x32xf32> to vector<8x16xf32>
      %89 = vector.extract_strided_slice %36 {offsets = [0, 16], sizes = [8, 16], strides = [1, 1]} : vector<8x32xf32> to vector<8x16xf32>
      %cst_33 = arith.constant 0.000000e+00 : f32
      %90 = vector.broadcast %cst_33 : f32 to vector<8x16xf32>
      %91 = arith.subf %90, %89 : vector<8x16xf32>
      %92 = tpu.concatenate %88, %91 in 1 : vector<8x16xf32>, vector<8x16xf32> -> vector<8x32xf32>
      %93 = vector.extract_strided_slice %36 {offsets = [0, 16], sizes = [8, 16], strides = [1, 1]} : vector<8x32xf32> to vector<8x16xf32>
      %94 = vector.extract_strided_slice %33 {offsets = [0, 16], sizes = [8, 16], strides = [1, 1]} : vector<8x32xf32> to vector<8x16xf32>
      %95 = tpu.concatenate %93, %94 in 1 : vector<8x16xf32>, vector<8x16xf32> -> vector<8x32xf32>
      %cst_34 = arith.constant dense<0.000000e+00> : vector<8x8xf32>
      %96 = tpu.matmul %87, %92, %cst_34 {dimension_numbers = #tpu.dot_dimension_numbers<[1], [1], [0], [0], [0, 0, 1, 0], [], []>} : vector<8x32xf32>, vector<8x32xf32>, vector<8x8xf32> -> vector<8x8xf32>
      %cst_35 = arith.constant dense<0.000000e+00> : vector<8x8xf32>
      %97 = tpu.matmul %87, %95, %cst_35 {dimension_numbers = #tpu.dot_dimension_numbers<[1], [1], [0], [0], [0, 0, 1, 0], [], []>} : vector<8x32xf32>, vector<8x32xf32>, vector<8x8xf32> -> vector<8x8xf32>
      %c1_36 = arith.constant 1 : index
      %98 = memref.load %arg3[%c1_36] : memref<2xf32, #tpu.memory_space<smem>>
      %99 = vector.broadcast %98 : f32 to vector<8x8xf32>
      %100 = arith.mulf %52, %99 : vector<8x8xf32>
      %101 = math.exp %100 : vector<8x8xf32>
      %cst_37 = arith.constant 0.000000e+00 : f32
      %102 = vector.broadcast %cst_37 : f32 to vector<8x8xf32>
      %103 = arith.select %49, %101, %102 : vector<8x8xi1>, vector<8x8xf32>
      %104 = arith.mulf %96, %103 : vector<8x8xf32>
      %105 = arith.mulf %97, %103 : vector<8x8xf32>
      %106 = tpu.concatenate %104, %105 in 1 : vector<8x8xf32>, vector<8x8xf32> -> vector<8x16xf32>
      %107 = vector.extract_strided_slice %27 {offsets = [0, 16], sizes = [8, 16], strides = [1, 1]} : vector<8x32xf32> to vector<8x16xf32>
      %108 = vector.extract_strided_slice %28 {offsets = [0, 16], sizes = [8, 16], strides = [1, 1]} : vector<8x32xf32> to vector<8x16xf32>
      %cst_38 = arith.constant 0.000000e+00 : f32
      %109 = vector.broadcast %cst_38 : f32 to vector<8x16xf32>
      %110 = arith.subf %109, %108 : vector<8x16xf32>
      %111 = tpu.concatenate %107, %110 in 0 : vector<8x16xf32>, vector<8x16xf32> -> vector<16x16xf32>
      %112 = vector.extract_strided_slice %28 {offsets = [0, 16], sizes = [8, 16], strides = [1, 1]} : vector<8x32xf32> to vector<8x16xf32>
      %113 = vector.extract_strided_slice %27 {offsets = [0, 16], sizes = [8, 16], strides = [1, 1]} : vector<8x32xf32> to vector<8x16xf32>
      %114 = tpu.concatenate %112, %113 in 0 : vector<8x16xf32>, vector<8x16xf32> -> vector<16x16xf32>
      %cst_39 = arith.constant dense<0.000000e+00> : vector<8x16xf32>
      %115 = tpu.matmul %106, %111, %cst_39 {dimension_numbers = #tpu.dot_dimension_numbers<[1], [0], [0], [1], [0, 0, 1, 1], [], []>} : vector<8x16xf32>, vector<16x16xf32>, vector<8x16xf32> -> vector<8x16xf32>
      %cst_40 = arith.constant dense<0.000000e+00> : vector<8x16xf32>
      %116 = tpu.matmul %106, %114, %cst_40 {dimension_numbers = #tpu.dot_dimension_numbers<[1], [0], [0], [1], [0, 0, 1, 1], [], []>} : vector<8x16xf32>, vector<16x16xf32>, vector<8x16xf32> -> vector<8x16xf32>
      %c0_41 = arith.constant 0 : index
      %c0_42 = arith.constant 0 : index
      %117 = vector.load %arg18[%c0_41, %c0_42] : memref<8x32xf32, #tpu.memory_space<vmem>>, vector<8x32xf32>
      %118 = tpu.concatenate %83, %115 in 1 : vector<8x16xf32>, vector<8x16xf32> -> vector<8x32xf32>
      %119 = arith.addf %117, %118 : vector<8x32xf32>
      %c0_43 = arith.constant 0 : index
      %c0_44 = arith.constant 0 : index
      %120 = vector.load %arg18[%c0_43, %c0_44] : memref<8x32xf32, #tpu.memory_space<vmem>>, vector<8x32xf32>
      tpu.vector_store %arg18[%c0_43, %c0_44], %119 {strides = array<i32>} : memref<8x32xf32, #tpu.memory_space<vmem>>, vector<8x32xf32>,
      %c0_45 = arith.constant 0 : index
      %c0_46 = arith.constant 0 : index
      %121 = vector.load %arg19[%c0_45, %c0_46] : memref<8x32xf32, #tpu.memory_space<vmem>>, vector<8x32xf32>
      %122 = tpu.concatenate %84, %116 in 1 : vector<8x16xf32>, vector<8x16xf32> -> vector<8x32xf32>
      %123 = arith.addf %121, %122 : vector<8x32xf32>
      %c0_47 = arith.constant 0 : index
      %c0_48 = arith.constant 0 : index
      %124 = vector.load %arg19[%c0_47, %c0_48] : memref<8x32xf32, #tpu.memory_space<vmem>>, vector<8x32xf32>
      tpu.vector_store %arg19[%c0_47, %c0_48], %123 {strides = array<i32>} : memref<8x32xf32, #tpu.memory_space<vmem>>, vector<8x32xf32>,
      %125 = arith.cmpi eq, %arg2, %arg1 : i32
      %126 = arith.extui %125 : i1 to i32
      %c0_i32_49 = arith.constant 0 : i32
      %127 = arith.cmpi ne, %126, %c0_i32_49 : i32
      scf.if %127 {
        %c0_50 = arith.constant 0 : index
        %c0_51 = arith.constant 0 : index
        %128 = vector.load %arg18[%c0_50, %c0_51] : memref<8x32xf32, #tpu.memory_space<vmem>>, vector<8x32xf32>
        %c0_52 = arith.constant 0 : index
        %c0_53 = arith.constant 0 : index
        %129 = vector.load %arg19[%c0_52, %c0_53] : memref<8x32xf32, #tpu.memory_space<vmem>>, vector<8x32xf32>
        %130 = vector.extract_strided_slice %128 {offsets = [0, 0], sizes = [8, 16], strides = [1, 1]} : vector<8x32xf32> to vector<8x16xf32>
        %131 = vector.extract_strided_slice %129 {offsets = [0, 0], sizes = [8, 16], strides = [1, 1]} : vector<8x32xf32> to vector<8x16xf32>
        %132 = arith.mulf %130, %130 : vector<8x16xf32>
        %133 = arith.mulf %131, %131 : vector<8x16xf32>
        %134 = arith.addf %132, %133 : vector<8x16xf32>
        %cst_54 = arith.constant dense<0.000000e+00> : vector<8xf32>
        %135 = vector.multi_reduction <add>, %134, %cst_54 [1] : vector<8x16xf32> to vector<8xf32>
        %136 = vector.shape_cast %135 : vector<8xf32> to vector<8x1xf32>
        %137 = math.rsqrt %136 : vector<8x1xf32>
        %138 = vector.shape_cast %137 : vector<8x1xf32> to vector<8x1xf32>
        %139 = vector.broadcast %138 : vector<8x1xf32> to vector<8x16xf32>
        %140 = vector.extract_strided_slice %128 {offsets = [0, 16], sizes = [8, 16], strides = [1, 1]} : vector<8x32xf32> to vector<8x16xf32>
        %141 = vector.extract_strided_slice %129 {offsets = [0, 16], sizes = [8, 16], strides = [1, 1]} : vector<8x32xf32> to vector<8x16xf32>
        %142 = arith.mulf %140, %140 : vector<8x16xf32>
        %143 = arith.mulf %141, %141 : vector<8x16xf32>
        %144 = arith.addf %142, %143 : vector<8x16xf32>
        %cst_55 = arith.constant dense<0.000000e+00> : vector<8xf32>
        %145 = vector.multi_reduction <add>, %144, %cst_55 [1] : vector<8x16xf32> to vector<8xf32>
        %146 = vector.shape_cast %145 : vector<8xf32> to vector<8x1xf32>
        %147 = math.rsqrt %146 : vector<8x1xf32>
        %148 = vector.shape_cast %147 : vector<8x1xf32> to vector<8x1xf32>
        %149 = vector.broadcast %148 : vector<8x1xf32> to vector<8x16xf32>
        %150 = tpu.concatenate %139, %149 in 1 : vector<8x16xf32>, vector<8x16xf32> -> vector<8x32xf32>
        %151 = arith.mulf %128, %150 : vector<8x32xf32>
        %152 = arith.mulf %129, %150 : vector<8x32xf32>
        %153 = tpu.concatenate %151, %152 in 0 : vector<8x32xf32>, vector<8x32xf32> -> vector<16x32xf32>
        %c0_56 = arith.constant 0 : index
        %c0_57 = arith.constant 0 : index
        %154 = vector.load %arg13[%c0_56, %c0_57] : memref<32x32xf32, #tpu.memory_space<vmem>>, vector<32x32xf32>
        %cst_58 = arith.constant dense<0.000000e+00> : vector<16x32xf32>
        %155 = tpu.matmul %153, %154, %cst_58 {dimension_numbers = #tpu.dot_dimension_numbers<[1], [0], [0], [1], [0, 0, 1, 1], [], []>} : vector<16x32xf32>, vector<32x32xf32>, vector<16x32xf32> -> vector<16x32xf32>
        %156 = vector.extract_strided_slice %155 {offsets = [0, 0], sizes = [8, 32], strides = [1, 1]} : vector<16x32xf32> to vector<8x32xf32>
        %157 = vector.extract_strided_slice %155 {offsets = [8, 0], sizes = [8, 32], strides = [1, 1]} : vector<16x32xf32> to vector<8x32xf32>
        %cst_59 = arith.constant -2.000000e+00 : f32
        %158 = vector.broadcast %cst_59 : f32 to vector<8x32xf32>
        %159 = arith.mulf %158, %156 : vector<8x32xf32>
        %160 = math.exp %159 : vector<8x32xf32>
        %cst_60 = arith.constant 2.000000e+00 : f32
        %161 = vector.broadcast %cst_60 : f32 to vector<8x32xf32>
        %162 = arith.mulf %161, %157 : vector<8x32xf32>
        %163 = math.cos %162 : vector<8x32xf32>
        %164 = arith.mulf %160, %163 : vector<8x32xf32>
        %cst_61 = arith.constant 1.000000e+00 : f32
        %165 = vector.broadcast %cst_61 : f32 to vector<8x32xf32>
        %166 = arith.addf %165, %164 : vector<8x32xf32>
        %cst_62 = arith.constant 0.000000e+00 : f32
        %167 = vector.broadcast %cst_62 : f32 to vector<8x32xf32>
        %168 = arith.subf %167, %160 : vector<8x32xf32>
        %cst_63 = arith.constant 2.000000e+00 : f32
        %169 = vector.broadcast %cst_63 : f32 to vector<8x32xf32>
        %170 = arith.mulf %169, %157 : vector<8x32xf32>
        %171 = math.sin %170 : vector<8x32xf32>
        %172 = arith.mulf %168, %171 : vector<8x32xf32>
        %173 = arith.mulf %166, %166 : vector<8x32xf32>
        %174 = arith.mulf %172, %172 : vector<8x32xf32>
        %175 = arith.addf %173, %174 : vector<8x32xf32>
        %cst_64 = arith.constant 1.000000e+00 : f32
        %176 = vector.broadcast %cst_64 : f32 to vector<8x32xf32>
        %177 = arith.divf %176, %175 : vector<8x32xf32>
        %178 = arith.mulf %156, %166 : vector<8x32xf32>
        %179 = arith.mulf %157, %172 : vector<8x32xf32>
        %180 = arith.addf %178, %179 : vector<8x32xf32>
        %181 = arith.mulf %180, %177 : vector<8x32xf32>
        %182 = arith.mulf %157, %166 : vector<8x32xf32>
        %183 = arith.mulf %156, %172 : vector<8x32xf32>
        %184 = arith.subf %182, %183 : vector<8x32xf32>
        %185 = arith.mulf %184, %177 : vector<8x32xf32>
        %186 = arith.mulf %151, %181 : vector<8x32xf32>
        %187 = arith.mulf %152, %185 : vector<8x32xf32>
        %188 = arith.subf %186, %187 : vector<8x32xf32>
        %189 = arith.mulf %151, %185 : vector<8x32xf32>
        %190 = arith.mulf %152, %181 : vector<8x32xf32>
        %191 = arith.addf %189, %190 : vector<8x32xf32>
        %192 = tpu.concatenate %188, %191 in 0 : vector<8x32xf32>, vector<8x32xf32> -> vector<16x32xf32>
        %c0_65 = arith.constant 0 : index
        %c0_66 = arith.constant 0 : index
        %193 = vector.load %arg14[%c0_65, %c0_66] : memref<32x32xf32, #tpu.memory_space<vmem>>, vector<32x32xf32>
        %cst_67 = arith.constant dense<0.000000e+00> : vector<16x32xf32>
        %194 = tpu.matmul %192, %193, %cst_67 {dimension_numbers = #tpu.dot_dimension_numbers<[1], [0], [0], [1], [0, 0, 1, 1], [], []>} : vector<16x32xf32>, vector<32x32xf32>, vector<16x32xf32> -> vector<16x32xf32>
        %c0_68 = arith.constant 0 : index
        %c0_69 = arith.constant 0 : index
        %c0_70 = arith.constant 0 : index
        %c0_71 = arith.constant 0 : index
        %195 = vector.load %arg4[%c0_68, %c0_69, %c0_70, %c0_71] : memref<1x2x8x32xf32, #tpu.memory_space<vmem>>, vector<1x1x8x32xf32>
        %196 = vector.shape_cast %195 : vector<1x1x8x32xf32> to vector<8x32xf32>
        %c0_72 = arith.constant 0 : index
        %c1_73 = arith.constant 1 : index
        %c0_74 = arith.constant 0 : index
        %c0_75 = arith.constant 0 : index
        %197 = vector.load %arg4[%c0_72, %c1_73, %c0_74, %c0_75] : memref<1x2x8x32xf32, #tpu.memory_space<vmem>>, vector<1x1x8x32xf32>
        %198 = vector.shape_cast %197 : vector<1x1x8x32xf32> to vector<8x32xf32>
        %199 = tpu.concatenate %196, %198 in 0 : vector<8x32xf32>, vector<8x32xf32> -> vector<16x32xf32>
        %200 = arith.addf %199, %194 : vector<16x32xf32>
        %201 = vector.extract_strided_slice %200 {offsets = [0, 0], sizes = [8, 32], strides = [1, 1]} : vector<16x32xf32> to vector<8x32xf32>
        %202 = vector.extract_strided_slice %200 {offsets = [8, 0], sizes = [8, 32], strides = [1, 1]} : vector<16x32xf32> to vector<8x32xf32>
        %203 = arith.mulf %201, %201 : vector<8x32xf32>
        %204 = arith.mulf %202, %202 : vector<8x32xf32>
        %205 = arith.addf %203, %204 : vector<8x32xf32>
        %cst_76 = arith.constant dense<0.000000e+00> : vector<8xf32>
        %206 = vector.multi_reduction <add>, %205, %cst_76 [1] : vector<8x32xf32> to vector<8xf32>
        %207 = vector.shape_cast %206 : vector<8xf32> to vector<8x1xf32>
        %208 = math.rsqrt %207 : vector<8x1xf32>
        %209 = vector.broadcast %208 : vector<8x1xf32> to vector<8x32xf32>
        %210 = arith.mulf %201, %209 : vector<8x32xf32>
        %211 = vector.broadcast %208 : vector<8x1xf32> to vector<8x32xf32>
        %212 = arith.mulf %202, %211 : vector<8x32xf32>
        %213 = tpu.concatenate %210, %212 in 0 : vector<8x32xf32>, vector<8x32xf32> -> vector<16x32xf32>
        %c0_77 = arith.constant 0 : index
        %c0_78 = arith.constant 0 : index
        %214 = vector.load %arg15[%c0_77, %c0_78] : memref<32x128xf32, #tpu.memory_space<vmem>>, vector<32x128xf32>
        %cst_79 = arith.constant dense<0.000000e+00> : vector<16x128xf32>
        %215 = tpu.matmul %213, %214, %cst_79 {dimension_numbers = #tpu.dot_dimension_numbers<[1], [0], [0], [1], [0, 0, 1, 1], [], []>} : vector<16x32xf32>, vector<32x128xf32>, vector<16x128xf32> -> vector<16x128xf32>
        %216 = vector.extract_strided_slice %215 {offsets = [0, 0], sizes = [8, 128], strides = [1, 1]} : vector<16x128xf32> to vector<8x128xf32>
        %217 = vector.extract_strided_slice %215 {offsets = [8, 0], sizes = [8, 128], strides = [1, 1]} : vector<16x128xf32> to vector<8x128xf32>
        %cst_80 = arith.constant 0.000000e+00 : f32
        %218 = vector.broadcast %cst_80 : f32 to vector<8x128xf32>
        %219 = arith.subf %218, %216 : vector<8x128xf32>
        %220 = math.exp %219 : vector<8x128xf32>
        %221 = math.cos %217 : vector<8x128xf32>
        %222 = arith.mulf %220, %221 : vector<8x128xf32>
        %cst_81 = arith.constant 1.000000e+00 : f32
        %223 = vector.broadcast %cst_81 : f32 to vector<8x128xf32>
        %224 = arith.addf %223, %222 : vector<8x128xf32>
        %cst_82 = arith.constant 0.000000e+00 : f32
        %225 = vector.broadcast %cst_82 : f32 to vector<8x128xf32>
        %226 = arith.subf %225, %220 : vector<8x128xf32>
        %227 = math.sin %217 : vector<8x128xf32>
        %228 = arith.mulf %226, %227 : vector<8x128xf32>
        %229 = arith.mulf %224, %224 : vector<8x128xf32>
        %230 = arith.mulf %228, %228 : vector<8x128xf32>
        %231 = arith.addf %229, %230 : vector<8x128xf32>
        %cst_83 = arith.constant 1.000000e+00 : f32
        %232 = vector.broadcast %cst_83 : f32 to vector<8x128xf32>
        %233 = arith.divf %232, %231 : vector<8x128xf32>
        %234 = arith.mulf %216, %224 : vector<8x128xf32>
        %235 = arith.mulf %217, %228 : vector<8x128xf32>
        %236 = arith.addf %234, %235 : vector<8x128xf32>
        %237 = arith.mulf %236, %233 : vector<8x128xf32>
        %238 = arith.mulf %217, %224 : vector<8x128xf32>
        %239 = arith.mulf %216, %228 : vector<8x128xf32>
        %240 = arith.subf %238, %239 : vector<8x128xf32>
        %241 = arith.mulf %240, %233 : vector<8x128xf32>
        %242 = tpu.concatenate %237, %241 in 0 : vector<8x128xf32>, vector<8x128xf32> -> vector<16x128xf32>
        %c0_84 = arith.constant 0 : index
        %c0_85 = arith.constant 0 : index
        %243 = vector.load %arg16[%c0_84, %c0_85] : memref<128x32xf32, #tpu.memory_space<vmem>>, vector<128x32xf32>
        %cst_86 = arith.constant dense<0.000000e+00> : vector<16x32xf32>
        %244 = tpu.matmul %242, %243, %cst_86 {dimension_numbers = #tpu.dot_dimension_numbers<[1], [0], [0], [1], [0, 0, 1, 1], [], []>} : vector<16x128xf32>, vector<128x32xf32>, vector<16x32xf32> -> vector<16x32xf32>
        %245 = arith.addf %200, %244 : vector<16x32xf32>
        %246 = vector.extract_strided_slice %245 {offsets = [0, 0], sizes = [8, 32], strides = [1, 1]} : vector<16x32xf32> to vector<8x32xf32>
        %c0_87 = arith.constant 0 : index
        %c0_88 = arith.constant 0 : index
        %c0_89 = arith.constant 0 : index
        %c0_90 = arith.constant 0 : index
        %247 = vector.load %arg17[%c0_87, %c0_88, %c0_89, %c0_90] : memref<1x2x8x32xf32, #tpu.memory_space<vmem>>, vector<1x1x8x32xf32>
        %248 = vector.shape_cast %247 : vector<1x1x8x32xf32> to vector<8x32xf32>
        %249 = vector.shape_cast %246 : vector<8x32xf32> to vector<1x1x8x32xf32>
        tpu.vector_store %arg17[%c0_87, %c0_88, %c0_89, %c0_90], %249 {strides = array<i32>} : memref<1x2x8x32xf32, #tpu.memory_space<vmem>>, vector<1x1x8x32xf32>,
        %250 = vector.extract_strided_slice %245 {offsets = [8, 0], sizes = [8, 32], strides = [1, 1]} : vector<16x32xf32> to vector<8x32xf32>
        %c0_91 = arith.constant 0 : index
        %c1_92 = arith.constant 1 : index
        %c0_93 = arith.constant 0 : index
        %c0_94 = arith.constant 0 : index
        %251 = vector.load %arg17[%c0_91, %c1_92, %c0_93, %c0_94] : memref<1x2x8x32xf32, #tpu.memory_space<vmem>>, vector<1x1x8x32xf32>
        %252 = vector.shape_cast %251 : vector<1x1x8x32xf32> to vector<8x32xf32>
        %253 = vector.shape_cast %250 : vector<8x32xf32> to vector<1x1x8x32xf32>
        tpu.vector_store %arg17[%c0_91, %c1_92, %c0_93, %c0_94], %253 {strides = array<i32>} : memref<1x2x8x32xf32, #tpu.memory_space<vmem>>, vector<1x1x8x32xf32>,
      } else {
      }
    } else {
    }
    return
  }
  func.func @transform_0(%arg0: i32, %arg1: i32, %arg2: i32) -> i32 {
    %c0_i32 = arith.constant 0 : i32
    %c0_i32_0 = arith.constant 0 : i32
    return %c0_i32 : i32
  }
  func.func @transform_1(%arg0: i32, %arg1: i32, %arg2: i32) -> (i32, i32, i32, i32) {
    %c0_i32 = arith.constant 0 : i32
    %c0_i32_0 = arith.constant 0 : i32
    %c0_i32_1 = arith.constant 0 : i32
    return %arg0, %c0_i32, %arg1, %c0_i32_0 : i32, i32, i32, i32
  }
  func.func @transform_2(%arg0: i32, %arg1: i32, %arg2: i32) -> (i32, i32, i32, i32) {
    %0 = arith.minsi %arg2, %arg1 : i32
    %c0_i32 = arith.constant 0 : i32
    %c0_i32_0 = arith.constant 0 : i32
    %c0_i32_1 = arith.constant 0 : i32
    return %arg0, %c0_i32, %0, %c0_i32_0 : i32, i32, i32, i32
  }
  func.func @transform_3(%arg0: i32, %arg1: i32, %arg2: i32) -> (i32, i32) {
    %c0_i32 = arith.constant 0 : i32
    %c0_i32_0 = arith.constant 0 : i32
    return %arg1, %c0_i32 : i32, i32
  }
  func.func @transform_4(%arg0: i32, %arg1: i32, %arg2: i32) -> (i32, i32) {
    %c0_i32 = arith.constant 0 : i32
    %c0_i32_0 = arith.constant 0 : i32
    return %arg1, %c0_i32 : i32, i32
  }
  func.func @transform_5(%arg0: i32, %arg1: i32, %arg2: i32) -> (i32, i32) {
    %0 = arith.minsi %arg2, %arg1 : i32
    %c0_i32 = arith.constant 0 : i32
    %c0_i32_0 = arith.constant 0 : i32
    return %0, %c0_i32 : i32, i32
  }
  func.func @transform_6(%arg0: i32, %arg1: i32, %arg2: i32) -> (i32, i32) {
    %0 = arith.minsi %arg2, %arg1 : i32
    %c0_i32 = arith.constant 0 : i32
    %c0_i32_0 = arith.constant 0 : i32
    return %0, %c0_i32 : i32, i32
  }
  func.func @transform_7(%arg0: i32, %arg1: i32, %arg2: i32) -> (i32, i32) {
    %c0_i32 = arith.constant 0 : i32
    %c0_i32_0 = arith.constant 0 : i32
    %c0_i32_1 = arith.constant 0 : i32
    return %c0_i32, %c0_i32_0 : i32, i32
  }
  func.func @transform_8(%arg0: i32, %arg1: i32, %arg2: i32) -> (i32, i32) {
    %c0_i32 = arith.constant 0 : i32
    %c0_i32_0 = arith.constant 0 : i32
    %c0_i32_1 = arith.constant 0 : i32
    return %c0_i32, %c0_i32_0 : i32, i32
  }
  func.func @transform_9(%arg0: i32, %arg1: i32, %arg2: i32) -> (i32, i32) {
    %c0_i32 = arith.constant 0 : i32
    %c0_i32_0 = arith.constant 0 : i32
    %c0_i32_1 = arith.constant 0 : i32
    return %c0_i32, %c0_i32_0 : i32, i32
  }
  func.func @transform_10(%arg0: i32, %arg1: i32, %arg2: i32) -> (i32, i32) {
    %c0_i32 = arith.constant 0 : i32
    %c0_i32_0 = arith.constant 0 : i32
    %c0_i32_1 = arith.constant 0 : i32
    return %c0_i32, %c0_i32_0 : i32, i32
  }
  func.func @transform_11(%arg0: i32, %arg1: i32, %arg2: i32) -> (i32, i32) {
    %c0_i32 = arith.constant 0 : i32
    %c0_i32_0 = arith.constant 0 : i32
    %c0_i32_1 = arith.constant 0 : i32
    return %c0_i32, %c0_i32_0 : i32, i32
  }
  func.func @transform_12(%arg0: i32, %arg1: i32, %arg2: i32) -> (i32, i32) {
    %c0_i32 = arith.constant 0 : i32
    %c0_i32_0 = arith.constant 0 : i32
    %c0_i32_1 = arith.constant 0 : i32
    return %c0_i32, %c0_i32_0 : i32, i32
  }
  func.func @transform_13(%arg0: i32, %arg1: i32, %arg2: i32) -> (i32, i32) {
    %c0_i32 = arith.constant 0 : i32
    %c0_i32_0 = arith.constant 0 : i32
    %c0_i32_1 = arith.constant 0 : i32
    return %c0_i32, %c0_i32_0 : i32, i32
  }
  func.func @transform_14(%arg0: i32, %arg1: i32, %arg2: i32) -> (i32, i32, i32, i32) {
    %c0_i32 = arith.constant 0 : i32
    %c0_i32_0 = arith.constant 0 : i32
    %c0_i32_1 = arith.constant 0 : i32
    return %arg0, %c0_i32, %arg1, %c0_i32_0 : i32, i32, i32, i32
  }
}

</mosaic_0001>

<bundles_post_ra>
// kernel: mul.20
= control target key start
LH: loop header
LB: loop body
LE: loop exit
PB: predicated region body
PF: predicated region fallthrough
CT: control target
= control target key end

     0   :  { %vm7_vm0 = vcmask 130048   ;;  %vm13_vm1 = vcmask 261248   ;;  %s39_s0 = inlined_call_operand.vmem [shape: f32[2,16], index: 0, kind: input, shape index: {}]   ;;  %s40_s1 = inlined_call_operand.vmem [shape: f32[32], index: 1, kind: output, shape index: {}]  }
   0x1   :  { %v4_v0 = vld [vmem:[%s39_s0] sm:$0x3]  ;;  %s22_s0 = smov 16  }
   0x2   :  { %5 = vst [vmem:[#allocation1] sm:$0x3] %v4_v0 }
   0x9   :  { %v10_v1 = vld [vmem:[#allocation1 + $0x1] sm:$0x1]   ;;  %v6_v2 = vld [vmem:[#allocation1] sm:$0x1]  }
   0xa   :  { %11 = vrot.lane.b32.xlu0 %v10_v1, %s22_s0  ;;  %8 = vst.msk [vmem:[#allocation0] sm:$0x1] %vm7_vm0, %v6_v2  }
  0x7c   :  { %v12_v3 = vpop.permute.xlu0 %11  }
  0x7d   :  { %14 = vst.msk [vmem:[#allocation0] sm:$0x1] %vm13_vm1, %v12_v3  }
  0x84   :  { %v18_v4 = vld [vmem:[#allocation0] sm:$0x1] }
  0x85   :  { %20 = vst [vmem:[%s40_s1] sm:$0x1] %v18_v4 }

// kernel: retnet_forward.5
= control target key start
LH: loop header
LB: loop body
LE: loop exit
PB: predicated region body
PF: predicated region fallthrough
CT: control target
= control target key end

     0   :  { %7 = vsyncpa [#allocation3], 0  ;;  %s884_s0 = inlined_call_operand.hbm [shape: f32[2,2,8,32], index: 0, kind: input, shape index: {}]   ;;  %s885_s1 = inlined_call_operand.hbm [shape: f32[32,50], index: 1, kind: input, shape index: {}]   ;;  %s886_s2 = inlined_call_operand.hbm [shape: f32[2,8,50], index: 2, kind: output, shape index: {}]  }
   0x1   :  { %9 = vsyncpa [#allocation3 + $0x1], 0 }
   0x2   :  { %10 = vsyncpa [#allocation6], 0 }
   0x3   :  { %11 = vsyncpa [#allocation4], 0 }
   0x4   :  { %13 = vsyncpa [#allocation4 + $0x1], 0  ;;  %s670_s9 = smov 0   ;;  %s672_s10 = smov 0  }
   0x5   :  { %s674_s11 = smov 0   ;;  %s676_s12 = smov 0  }
   0x6   :  { %s678_s13 = smov 0   ;;  %s680_s14 = smov 0  }
   0x7 LB: > { %s383_s15 = sadd.s32 4294967295, %s645_s14   ;;  %s384_s16 = sadd.s32 4294967294, %s645_s14   ;;  %s645_s14 = sphi %s680_s14, %s19_s14   ;;  %s641_s13 = sphi %s678_s13, %s910_s13   ;;  %s637_s12 = sphi %s676_s12, %s909_s12   ;;  %s633_s11 = sphi %s674_s11, %s908_s11   ;;  %s629_s10 = sphi %s672_s10, %s907_s10   ;;  %s625_s9 = sphi %s670_s9, %s906_s9  }
   0x8   : > { %p51_p0 = scmp.ne.s32.totalorder %s629_s10, %s625_s9  ;;  %p704_p1 = scmp.eq.s32.totalorder %s383_s15, 0 }
   0x9   : > { %p708_p2 = scmp.eq.s32.totalorder %s383_s15, 1  ;;  %p109_p3 = scmp.eq.s32.totalorder %s384_s16, 1 }
   0xa   : > { %s891_s17 = scalar_select %p704_p1, 1, 0 }
   0xb   : > { %s892_s18 = scalar_select %p708_p2, 1, 0 }
   0xc   : > { %p714_p4 = por %p704_p1, %p51_p0  ;;  %p385_p5 = scmp.ge.s32.totalorder %s645_s14, 1 }
   0xd   : > { %p719_p6 = por %p109_p3, %p51_p0  ;;  %p116_p7 = scmp.lt.s32.totalorder %s645_s14, 3 }
   0xe   : > { %s893_s19 = scalar_select %p714_p4, 1, 0 }
   0xf   : > { %s894_s20 = scalar_select %p719_p6, 1, 0 }
  0x10   : > { %p724_p8 = pnand %p385_p5, %p116_p7  ;;  %s647_s22 = smov [#allocation5]  }
  0x11   : > { %s130_s23 = sshll.u32 %s647_s22, 4  ;;  %s31_s25 = sadd.s32 1, %s641_s13  ;;  %s131_s23 = int_to_ptr.vmem [resolvable:$true] %s130_s23 }
  0x12   : > { %s895_s21 = scalar_select %p724_p8, 1, 0 }
  0x13   : > { %p431_p9 = pneg %p724_p8  ;;  %s501_s28 = scalar_lea.hbm %s885_s1, 512 }
  0x14   : > { %p502_p12 = scmp.ne.s32.totalorder %s885_s1, %s501_s28  ;;  %p508_p5 = scmp.lt.u32.totalorder %s501_s28, %s885_s1 }
  0x15   : > { %p733_p11 = pnand %p431_p9, %p704_p1 }
  0x17   : > { %p503_p13 = pneg %p733_p11 }
  0x19   : > { %p504_p0 = pnand %p503_p13, %p502_p12 }
  0x1b   : > { %p505_p3 = pneg %p504_p0 }
  0x1d   : > { %p510_p7 = pnand %p508_p5, %p505_p3 }
  0x1f   : > { %513 = shalt.err (!%p510_p7)
}
  0x20   : > { %s514_s5 = scalar_lea.vmem %s131_s23, 512  ;;  %p522_p1 = scmp.lt.s32.totalorder %s131_s23, %s131_s23 }
  0x21   : > { %p515_p9 = scmp.ne.s32.totalorder %s131_s23, %s514_s5  ;;  %p523_p4 = scmp.lt.s32.totalorder %s514_s5, %s514_s5 }
  0x23   : > { %p517_p10 = pnand %p515_p9, %p503_p13  ;;  %p524_p8 = por %p523_p4, %p522_p1 }
  0x25   : > { %p518_p6 = pneg %p517_p10 }
  0x27   : > { %p525_p2 = pnand %p524_p8, %p518_p6 }
  0x29   : > { %528 = shalt.err (!%p525_p2)
}
  0x2a   : > { %s648_s6 = smov 128   ;;  %s649_s7 = smov 8  }
  0x2b   : > { %434 = dma.hbm_to_vmem [thread:$0]  (!%p733_p11), %s885_s1, 512, %s131_s23, [#allocation6], %s648_s6, %s648_s6, %s649_s7  }
  0x2c   : > { %p33_p1 = scmp.ge.s32.totalorder %s31_s25, 2  ;;  %s38_s16 = sadd.s32 1, %s633_s11 }
  0x2d   : > { %p45_p2 = scmp.ne.s32.totalorder %s633_s11, %s629_s10  ;;  %p46_p4 = scmp.eq.s32.totalorder %s645_s14, 0 }
  0x2e   : > { %s912_s25 = smov (%p33_p1, %s31_s25), 0  ;;  %p898_p8 = scmp.ne.s32.totalorder %s892_s18, 0 }
  0x2f   : > { %p760_p6 = por %p46_p4, %p45_p2  ;;  %s35_s24 = ssub.s32 %s641_s13, %s912_s25 }
  0x30   : > { %p766_p10 = por %p898_p8, %p45_p2  ;;  %p444_p12 = scmp.lt.s32.totalorder %s645_s14, 2 }
  0x31   : > { %p36_p11 = scmp.eq.s32.totalorder %s35_s24, 0  ;;  %s144_s23 = sand.u32 1, %s633_s11  }
  0x32   : > { %s388_s27 = sshll.u32 %s144_s23, 3  ;;  %s400_s29 = sshll.u32 %s641_s13, 8 }
  0x33   : > { %s775_s28 = scalar_select %p36_p11, %s633_s11, %s38_s16  }
  0x34   : > { %s781_s4 = scalar_lea.hbm %s884_s0, %s400_s29  ;;  %s148_s18 = scalar_lea.vmem [#allocation2], %s388_s27 }
  0x35   : > { %s156_s5 = sshll.u32 %s148_s18, 4  ;;  %p787_p13 = pnand %p444_p12, %p760_p6  ;;  %s783_s5 = int_to_ptr.vmem [resolvable:$true] %s156_s5 }
  0x36   : > { %s145_s7 = scalar_lea.sflag [#allocation3], %s144_s23  ;;  %s529_s8 = scalar_lea.hbm %s781_s4, 128 }
  0x37   : > { %p530_p0 = scmp.ne.s32.totalorder %s781_s4, %s529_s8  ;;  %p531_p3 = pneg %p787_p13 }
  0x38   : > { %s534_s24 = scalar_lea.hbm %s884_s0, 512  ;;  %p535_p9 = scmp.lt.u32.totalorder %s781_s4, %s884_s0 }
  0x39   : > { %p532_p5 = pnand %p531_p3, %p530_p0  ;;  %p536_p1 = scmp.lt.u32.totalorder %s534_s24, %s529_s8 }
  0x3a   : > { %p538_p4 = scmp.lt.u32.totalorder %s529_s8, %s781_s4 }
  0x3b   : > { %p533_p7 = pneg %p532_p5  ;;  %p537_p2 = por %p536_p1, %p535_p9 }
  0x3d   : > { %p539_p6 = por %p538_p4, %p537_p2 }
  0x3f   : > { %p540_p8 = pnand %p539_p6, %p533_p7 }
  0x41   : > { %543 = shalt.err (!%p540_p8)
}
  0x42   : > { %s544_s23 = scalar_lea.vmem %s783_s5, 128  ;;  %s650_s29 = smov [#allocation2]  }
  0x43   : > { %p545_p12 = scmp.ne.s32.totalorder %s783_s5, %s544_s23  ;;  %s549_s30 = sshll.u32 %s650_s29, 4  ;;  %s550_s30 = int_to_ptr.vmem [resolvable:$false] %s549_s30 }
  0x44   : > { %s551_s3 = scalar_lea.vmem %s550_s30, 256  ;;  %p552_p5 = scmp.lt.s32.totalorder %s783_s5, %s550_s30 }
  0x45   : > { %p547_p11 = pnand %p545_p12, %p531_p3  ;;  %p553_p9 = scmp.lt.s32.totalorder %s551_s3, %s544_s23 }
  0x47   : > { %p548_p0 = pneg %p547_p11  ;;  %p554_p1 = por %p553_p9, %p552_p5 }
  0x49   : > { %p555_p2 = pnand %p554_p1, %p548_p0 }
  0x4b   : > { %558 = shalt.err (!%p555_p2)
}
  0x4c   : > { %438 = dma.hbm_to_vmem [thread:$0]  (!%p787_p13), %s781_s4, 128, %s783_s5, %s145_s7  }
  0x4d   : > { %p901_p7 = scmp.ne.s32.totalorder %s895_s21, 0 }
  0x4e   : > { %s819_s18 = sand.u32 (!%p901_p7), 1, %s629_s10   ;;  %p902_p3 = scmp.ne.s32.totalorder (!%p901_p7), %s893_s19, 0 }
  0x4f   : > { %165 = sbr.rel (%p901_p7) target bundleno = 327 (0x147), region = 28  ;;  %s392_s8 = sshll.u32 (!%p901_p7), %s819_s18, 3 }
  0x50   : > { %s168_s15 = scalar_lea.sflag (!%p901_p7), [#allocation3], %s819_s18  ;;  %s171_s16 = scalar_lea.vmem (!%p901_p7), [#allocation2], %s392_s8 }
  0x56   : > { %612 = dma.done.wait (%p902_p3), %s168_s15, 128  }
  0x57   : > { %614 = vsyncadd (%p902_p3), %s168_s15, 4294967168  ;;  %p903_p4 = scmp.ne.s32.totalorder %s891_s17, 0 }
  0x59   : > { %616 = dma.done.wait (%p903_p4), [#allocation6], 512  }
  0x5a   : > { %618 = vsyncadd (%p903_p4), [#allocation6], 4294966784  ;;  %v651_v0 = vmov 0.0|0.0   ;;  %vm652_vm0 = vmmov 0   ;;  %v653_v1 = vmov 0.0   ;;  %v197_v2 = vld [vmem:[#allocation5] sm:$0xff] }
  0x5b   : > { %417 = vmatprep.subr.bf16.mxu0 %v651_v0  ;;  %414 = vmatprep.mubr.msk.f32.mxu0 %vm652_vm0, %v653_v1  ;;  %v198_v3 = vld [vmem:[#allocation5 + $0x8] sm:$0xff]  ;;  %v199_v4 = vld [vmem:[#allocation5 + $0x10] sm:$0xff]  ;;  %v200_v6 = vld [vmem:[#allocation5 + $0x18] sm:$0xff]  ;;  %vm201_vm1 = vcmask 261120   ;;  %s397_s17 = sshll.u32 %s637_s12, 7  ;;  %s195_s19 = scalar_lea.vmem [#allocation7], %s392_s8 }
  0x5c   : > { %v418_v5 = vpack.c.bf16 %v198_v3, %v197_v2  ;;  %v421_v7 = vpack.c.bf16 %v200_v6, %v199_v4  ;;  %v196_v8 = vld [vmem:[%s171_s16] sm:$0xff]  ;;  %s292_s21 = sshll.u32 %s195_s19, 4  ;;  %vm275_vm2 = vcmask 408576   ;;  %s835_s6 = scalar_lea.hbm %s886_s2, %s397_s17  ;;  %s837_s21 = int_to_ptr.vmem [resolvable:$true] %s292_s21 }
  0x5d   : > { %s278_s7 = scalar_lea.sflag [#allocation4], %s819_s18  ;;  %s559_s24 = scalar_lea.vmem %s837_s21, 128 }
  0x5e   : > { %419 = vmatpush3.bf16.msra.mxu0 %v418_v5  ;;  %p560_p13 = scmp.ne.s32.totalorder %s837_s21, %s559_s24  ;;  %s654_s12 = smov [#allocation7]  }
  0x5f   : > { %420 = vmatprep.subr.bf16.mxu0 %v651_v0  ;;  %s563_s22 = sshll.u32 %s654_s12, 4  ;;  %s564_s22 = int_to_ptr.vmem [resolvable:$false] %s563_s22 }
  0x60   : > { %p561_p6 = pnand %p560_p13, %p766_p10  ;;  %s565_s27 = scalar_lea.vmem %s564_s22, 256 }
  0x61   : > { %p566_p12 = scmp.lt.s32.totalorder %s837_s21, %s564_s22  ;;  %p567_p11 = scmp.lt.s32.totalorder %s565_s27, %s559_s24 }
  0x62   : > { %422 = vmatpush3.bf16.msra.mxu0 %v421_v7  ;;  %p562_p8 = pneg %p561_p6 }
  0x63   : > { %p568_p0 = por %p567_p11, %p566_p12 }
  0x65   : > { %415 = vmatmul.mubr.msk.f32.vlgmr.msra.gmra.mrb[0].mxu0 %vm201_vm1, %v196_v8  ;;  %p569_p5 = pnand %p568_p0, %p562_p8 }
 0x138   : > { %v271_v9 = vpop.f32.mrb[0].mxu0 }
 0x139   : > { %276 = vst.msk [vmem:[%s195_s19] sm:$0xff] %vm275_vm2, %v271_v9  ;;  %v416_v10 = vpop.f32.mrb[1].mxu0 }
 0x13a   : > { %572 = shalt.err (!%p569_p5)
}
 0x13b   : > { %s573_s23 = scalar_lea.hbm %s835_s6, 128  ;;  %s577_s3 = scalar_lea.hbm %s886_s2, 256 }
 0x13c   : > { %p574_p9 = scmp.ne.s32.totalorder %s835_s6, %s573_s23  ;;  %p578_p7 = scmp.lt.u32.totalorder %s835_s6, %s886_s2 }
 0x13d   : > { %p579_p3 = scmp.lt.u32.totalorder %s577_s3, %s573_s23  ;;  %p581_p13 = scmp.lt.u32.totalorder %s573_s23, %s835_s6 }
 0x13e   : > { %p575_p1 = pnand %p574_p9, %p766_p10 }
 0x13f   : > { %p580_p4 = por %p579_p3, %p578_p7 }
 0x140   : > { %p576_p2 = pneg %p575_p1 }
 0x141   : > { %p582_p6 = por %p581_p13, %p580_p4 }
 0x143   : > { %p583_p8 = pnand %p582_p6, %p576_p2 }
 0x145   : > { %586 = shalt.err (!%p583_p8)
}
 0x146   : > { %429 = dma.vmem_to_hbm [thread:$0]  (%p766_p10), %s837_s21, 128, %s835_s6, %s278_s7  }
 0x147 PF: > { %s304_s15 = sand.u32 1, %s625_s9   ;;  %p904_p12 = scmp.ne.s32.totalorder %s894_s20, 0 }
 0x148   : > { %p905_p11 = scmp.ge.s32.totalorder %s645_s14, 2  ;;  %s305_s16 = scalar_lea.sflag [#allocation4], %s304_s15 }
 0x14a   : > { %p440_p0 = pnand %p905_p11, %p904_p12 }
 0x14c   : > { %620 = dma.done.wait (!%p440_p0), %s305_s16, 128  }
 0x14d   : > { %622 = vsyncadd (!%p440_p0), %s305_s16, 4294967168  ;;  %s19_s14 = sadd.s32 1, %s645_s14   ;;  %s906_s9 = smov %s629_s10 }
 0x14e   : > { %p16_p5 = scmp.ge.s32.totalorder %s19_s14, 4   ;;  %s907_s10 = smov %s633_s11 }
 0x14f   : > { %s908_s11 = smov %s775_s28  ;;  %s909_s12 = smov %s641_s13 }
 0x150   : > { %s910_s13 = smov %s912_s25  ;;  %18 = sbr.rel (!%p16_p5) target bundleno = 7 (0x7), region = 78 }
 0x157   :  { %310 = vsyncpa [#allocation3], 1 }
 0x158   :  { %312 = vsyncpa [#allocation3 + $0x1], 1 }
 0x159   :  { %313 = vsyncpa [#allocation6], 1 }
 0x15a   :  { %314 = vsyncpa [#allocation4], 1 }
 0x15b   :  { %316 = vsyncpa [#allocation4 + $0x1], 1 }

// kernel: retnet_forward.3
= control target key start
LH: loop header
LB: loop body
LE: loop exit
PB: predicated region body
PF: predicated region fallthrough
CT: control target
= control target key end

     0   :  { %s4874_s0 = inlined_call_operand.hbm [shape: f32[2], index: 0, kind: input, shape index: {}]   ;;  %s4875_s1 = inlined_call_operand.hbm [shape: f32[2,2,8,32], index: 1, kind: input, shape index: {}, may-alias: {1,2}]   ;;  %s4876_s2 = inlined_call_operand.hbm [shape: f32[2,2,8,32], index: 2, kind: input, shape index: {}, may-alias: {1,2}]   ;;  %s4877_s3 = inlined_call_operand.hbm [shape: f32[8,32], index: 3, kind: input, shape index: {}, may-alias: {3,5}]   ;;  %s4878_s4 = inlined_call_operand.hbm [shape: f32[8,32], index: 4, kind: input, shape index: {}, may-alias: {4,6}]   ;;  %s4879_s5 = inlined_call_operand.hbm [shape: f32[8,32], index: 5, kind: input, shape index: {}, may-alias: {3,5}]   ;;  %s4880_s6 = inlined_call_operand.hbm [shape: f32[8,32], index: 6, kind: input, shape index: {}, may-alias: {4,6}]   ;;  %s4881_s7 = inlined_call_operand.hbm [shape: f32[32,32], index: 7, kind: input, shape index: {}]   ;;  %s4882_s8 = inlined_call_operand.hbm [shape: f32[32,32], index: 8, kind: input, shape index: {}]   ;;  %s4883_s9 = inlined_call_operand.hbm [shape: f32[32,32], index: 9, kind: input, shape index: {}]   ;;  %s4884_s10 = inlined_call_operand.hbm [shape: f32[32,32], index: 10, kind: input, shape index: {}]   ;;  %s4885_s11 = inlined_call_operand.hbm [shape: f32[32,32], index: 11, kind: input, shape index: {}]   ;;  %s4886_s12 = inlined_call_operand.hbm [shape: f32[32,128], index: 12, kind: input, shape index: {}]   ;;  %s4887_s13 = inlined_call_operand.hbm [shape: f32[128,32], index: 13, kind: input, shape index: {}]   ;;  %s4888_s14 = inlined_call_operand.hbm [shape: f32[2,2,8,32], index: 14, kind: output, shape index: {}]  }
   0x1   :  { %4903 = sst [smem:[#allocation43_spill]] %s4874_s0 }
   0x2   :  { %4904 = sst [smem:[#allocation44_spill]] %s4875_s1 }
   0x3   :  { %4905 = sst [smem:[#allocation45_spill]] %s4876_s2 }
   0x4   :  { %4906 = sst [smem:[#allocation46_spill]] %s4877_s3 }
   0x5   :  { %4907 = sst [smem:[#allocation47_spill]] %s4878_s4 }
   0x6   :  { %4908 = sst [smem:[#allocation48_spill]] %s4879_s5 }
   0x7   :  { %4909 = sst [smem:[#allocation49_spill]] %s4880_s6 }
   0x8   :  { %4910 = sst [smem:[#allocation50_spill]] %s4881_s7 }
   0x9   :  { %4911 = sst [smem:[#allocation51_spill]] %s4882_s8 }
   0xa   :  { %4912 = sst [smem:[#allocation52_spill]] %s4883_s9 }
   0xb   :  { %4913 = sst [smem:[#allocation53_spill]] %s4884_s10 }
   0xc   :  { %4914 = sst [smem:[#allocation54_spill]] %s4885_s11 }
   0xd   :  { %4915 = sst [smem:[#allocation55_spill]] %s4886_s12 }
   0xe   :  { %4916 = sst [smem:[#allocation56_spill]] %s4888_s14 }
   0xf   :  { %19 = vsyncpa [#allocation9], 0 }
  0x10   :  { %20 = vsyncpa [#allocation7], 0 }
  0x11   :  { %22 = vsyncpa [#allocation7 + $0x1], 0 }
  0x12   :  { %23 = vsyncpa [#allocation12], 0 }
  0x13   :  { %25 = vsyncpa [#allocation12 + $0x1], 0 }
  0x14   :  { %26 = vsyncpa [#allocation15], 0 }
  0x15   :  { %27 = vsyncpa [#allocation18], 0 }
  0x16   :  { %28 = vsyncpa [#allocation21], 0 }
  0x17   :  { %29 = vsyncpa [#allocation24], 0 }
  0x18   :  { %30 = vsyncpa [#allocation27], 0 }
  0x19   :  { %31 = vsyncpa [#allocation8], 0 }
  0x1a   :  { %33 = vsyncpa [#allocation8 + $0x1], 0  ;;  %s4117_s29 = smov 0   ;;  %s4119_s30 = smov 0  }
  0x1b   :  { %s4121_s15 = smov 0   ;;  %s4123_s16 = smov 0  }
  0x1c   :  { %s4125_s17 = smov 0   ;;  %s4127_s18 = smov 0  }
  0x1d LB: > { %4917 = sst [smem:[#allocation40_spill]] %s4002_s16  ;;  %s4012_s19 = smov [#allocation13]   ;;  %s4010_s18 = sphi %s4127_s18, %s39_s18   ;;  %s4006_s17 = sphi %s4125_s17, %s4971_s17   ;;  %s4002_s16 = sphi %s4123_s16, %s4970_s16   ;;  %s3998_s15 = sphi %s4121_s15, %s4969_s15   ;;  %s3994_s30 = sphi %s4119_s30, %s4968_s30   ;;  %s3990_s29 = sphi %s4117_s29, %s4967_s29  }
  0x1e   : > { %s455_s20 = sshll.u32 %s4012_s19, 4  ;;  %s4148_s21 = sadd.s32 4294967295, %s4010_s18   ;;  %s456_s20 = int_to_ptr.vmem [resolvable:$true] %s455_s20 }
  0x1f   : > { %4918 = sst [smem:[#allocation41_spill]] %s4148_s21  ;;  %p2863_p0 = scmp.ge.s32.totalorder %s4010_s18, 1 }
  0x20   : > { %p4892_p1 = scmp.eq.s32.totalorder %s4148_s21, 0  ;;  %p431_p2 = scmp.lt.s32.totalorder %s4010_s18, 3 }
  0x21   : > { %s4013_s23 = smov [#allocation14]   ;;  %s4014_s25 = smov [#allocation17]  }
  0x22   : > { %p4153_p3 = pnand %p2863_p0, %p431_p2  ;;  %s468_s24 = sshll.u32 %s4013_s23, 4  ;;  %s4160_s24 = int_to_ptr.vmem [resolvable:$true] %s468_s24 }
  0x23   : > { %s498_s26 = sshll.u32 %s4014_s25, 4  ;;  %s4922_s3 = sld [smem:[#allocation46_spill]]  ;;  %s4168_s26 = int_to_ptr.vmem [resolvable:$true] %s498_s26 }
  0x24   : > { %s4919_s22 = scalar_select %p4153_p3, 1, 0 }
  0x25   : > { %p3331_p5 = pneg %p4153_p3 }
  0x26   : > { %4920 = sst [smem:[#allocation42_spill]] %s4919_s22 }
  0x27   : > { %p4164_p6 = pnand %p3331_p5, %p4892_p1 }
  0x29   : > { %s3515_s14 = scalar_lea.hbm %s4922_s3, 128  ;;  %p4178_p8 = pneg %p4164_p6 }
  0x2a   : > { %p3516_p7 = scmp.ne.s32.totalorder %s4922_s3, %s3515_s14  ;;  %p3522_p11 = scmp.lt.u32.totalorder %s3515_s14, %s4922_s3 }
  0x2c   : > { %p3518_p9 = pnand %p4178_p8, %p3516_p7 }
  0x2e   : > { %p3519_p10 = pneg %p3518_p9 }
  0x30   : > { %p3524_p12 = pnand %p3522_p11, %p3519_p10 }
  0x32   : > { %3527 = shalt.err (!%p3524_p12)
}
  0x33   : > { %s3528_s28 = scalar_lea.vmem %s456_s20, 128  ;;  %p3536_p5 = scmp.lt.s32.totalorder %s456_s20, %s456_s20 }
  0x34   : > { %p3529_p13 = scmp.ne.s32.totalorder %s456_s20, %s3528_s28  ;;  %p3537_p4 = scmp.lt.s32.totalorder %s3528_s28, %s3528_s28 }
  0x36   : > { %p3531_p0 = pnand %p3529_p13, %p4178_p8  ;;  %p3538_p1 = por %p3537_p4, %p3536_p5 }
  0x38   : > { %p3532_p2 = pneg %p3531_p0 }
  0x3a   : > { %p3539_p3 = pnand %p3538_p1, %p3532_p2 }
  0x3c   : > { %3542 = shalt.err (!%p3539_p3)
}
  0x3d   : > { %3337 = dma.hbm_to_vmem [thread:$0]  (!%p4164_p6), %s4922_s3, 128, %s456_s20, [#allocation12]  }
  0x3e   : > { %s4924_s4 = sld [smem:[#allocation47_spill]] }
  0x44   : > { %s3543_s19 = scalar_lea.hbm %s4924_s4, 128 }
  0x45   : > { %p3544_p7 = scmp.ne.s32.totalorder %s4924_s4, %s3543_s19  ;;  %p3550_p1 = scmp.lt.u32.totalorder %s3543_s19, %s4924_s4 }
  0x47   : > { %p3546_p9 = pnand %p3544_p7, %p4178_p8 }
  0x49   : > { %p3547_p4 = pneg %p3546_p9 }
  0x4b   : > { %p3552_p3 = pnand %p3550_p1, %p3547_p4 }
  0x4d   : > { %3555 = shalt.err (!%p3552_p3)
}
  0x4e   : > { %s3556_s20 = scalar_lea.vmem %s4160_s24, 128  ;;  %p3564_p13 = scmp.lt.s32.totalorder %s4160_s24, %s4160_s24 }
  0x4f   : > { %p3557_p10 = scmp.ne.s32.totalorder %s4160_s24, %s3556_s20  ;;  %p3565_p0 = scmp.lt.s32.totalorder %s3556_s20, %s3556_s20 }
  0x51   : > { %p3559_p11 = pnand %p3557_p10, %p4178_p8  ;;  %p3566_p2 = por %p3565_p0, %p3564_p13 }
  0x53   : > { %p3560_p12 = pneg %p3559_p11 }
  0x55   : > { %p3567_p5 = pnand %p3566_p2, %p3560_p12 }
  0x57   : > { %3570 = shalt.err (!%p3567_p5)
}
  0x58   : > { %3340 = dma.hbm_to_vmem [thread:$0]  (!%p4164_p6), %s4924_s4, 128, %s4160_s24, [#allocation15]  }
  0x59   : > { %s4925_s6 = sld [smem:[#allocation49_spill]] }
  0x5f   : > { %s3571_s2 = scalar_lea.hbm %s4925_s6, 128 }
  0x60   : > { %p3572_p7 = scmp.ne.s32.totalorder %s4925_s6, %s3571_s2  ;;  %p3578_p1 = scmp.lt.u32.totalorder %s3571_s2, %s4925_s6 }
  0x62   : > { %p3574_p9 = pnand %p3572_p7, %p4178_p8 }
  0x64   : > { %p3575_p4 = pneg %p3574_p9 }
  0x66   : > { %p3580_p3 = pnand %p3578_p1, %p3575_p4 }
  0x68   : > { %3583 = shalt.err (!%p3580_p3)
}
  0x69   : > { %s3584_s24 = scalar_lea.vmem %s4168_s26, 128  ;;  %p3592_p13 = scmp.lt.s32.totalorder %s4168_s26, %s4168_s26 }
  0x6a   : > { %p3585_p10 = scmp.ne.s32.totalorder %s4168_s26, %s3584_s24  ;;  %p3593_p0 = scmp.lt.s32.totalorder %s3584_s24, %s3584_s24 }
  0x6c   : > { %p3587_p11 = pnand %p3585_p10, %p4178_p8  ;;  %p3594_p2 = por %p3593_p0, %p3592_p13 }
  0x6e   : > { %p3588_p12 = pneg %p3587_p11 }
  0x70   : > { %p3595_p5 = pnand %p3594_p2, %p3588_p12 }
  0x72   : > { %3598 = shalt.err (!%p3595_p5)
}
  0x73   : > { %3346 = dma.hbm_to_vmem [thread:$0]  (!%p4164_p6), %s4925_s6, 128, %s4168_s26, [#allocation18]  }
  0x74   : > { %s4015_s21 = smov [#allocation20]   ;;  %s4016_s22 = smov [#allocation23]  }
  0x75   : > { %s521_s16 = sshll.u32 %s4015_s21, 4  ;;  %s547_s2 = sshll.u32 %s4016_s22, 4  ;;  %s522_s16 = int_to_ptr.vmem [resolvable:$true] %s521_s16  ;;  %s548_s2 = int_to_ptr.vmem [resolvable:$true] %s547_s2 }
  0x76   : > { %s4926_s8 = sld [smem:[#allocation51_spill]] }
  0x7c   : > { %s3599_s25 = scalar_lea.hbm %s4926_s8, 512 }
  0x7d   : > { %p3600_p7 = scmp.ne.s32.totalorder %s4926_s8, %s3599_s25  ;;  %p3606_p1 = scmp.lt.u32.totalorder %s3599_s25, %s4926_s8 }
  0x7f   : > { %p3602_p9 = pnand %p3600_p7, %p4178_p8 }
  0x81   : > { %p3603_p4 = pneg %p3602_p9 }
  0x83   : > { %p3608_p3 = pnand %p3606_p1, %p3603_p4 }
  0x85   : > { %3611 = shalt.err (!%p3608_p3)
}
  0x86   : > { %s3612_s26 = scalar_lea.vmem %s522_s16, 512  ;;  %p3620_p13 = scmp.lt.s32.totalorder %s522_s16, %s522_s16 }
  0x87   : > { %p3613_p10 = scmp.ne.s32.totalorder %s522_s16, %s3612_s26  ;;  %p3621_p0 = scmp.lt.s32.totalorder %s3612_s26, %s3612_s26 }
  0x89   : > { %p3615_p11 = pnand %p3613_p10, %p4178_p8  ;;  %p3622_p2 = por %p3621_p0, %p3620_p13 }
  0x8b   : > { %p3616_p12 = pneg %p3615_p11 }
  0x8d   : > { %p3623_p5 = pnand %p3622_p2, %p3616_p12 }
  0x8f   : > { %3626 = shalt.err (!%p3623_p5)
}
  0x90   : > { %s4898_s1 = smov 128   ;;  %s4900_s21 = smov 8  }
  0x91   : > { %3352 = dma.hbm_to_vmem [thread:$0]  (!%p4164_p6), %s4926_s8, 512, %s522_s16, [#allocation21], %s4898_s1, %s4898_s1, %s4900_s21  }
  0x92   : > { %s4927_s10 = sld [smem:[#allocation53_spill]] }
  0x98   : > { %s3627_s25 = scalar_lea.hbm %s4927_s10, 512 }
  0x99   : > { %p3628_p7 = scmp.ne.s32.totalorder %s4927_s10, %s3627_s25  ;;  %p3634_p1 = scmp.lt.u32.totalorder %s3627_s25, %s4927_s10 }
  0x9b   : > { %p3630_p9 = pnand %p3628_p7, %p4178_p8 }
  0x9d   : > { %p3631_p4 = pneg %p3630_p9 }
  0x9f   : > { %p3636_p3 = pnand %p3634_p1, %p3631_p4 }
  0xa1   : > { %3639 = shalt.err (!%p3636_p3)
}
  0xa2   : > { %s3640_s3 = scalar_lea.vmem %s548_s2, 512  ;;  %p3648_p13 = scmp.lt.s32.totalorder %s548_s2, %s548_s2 }
  0xa3   : > { %p3641_p10 = scmp.ne.s32.totalorder %s548_s2, %s3640_s3  ;;  %p3649_p0 = scmp.lt.s32.totalorder %s3640_s3, %s3640_s3 }
  0xa5   : > { %p3643_p11 = pnand %p3641_p10, %p4178_p8  ;;  %p3650_p2 = por %p3649_p0, %p3648_p13 }
  0xa7   : > { %p3644_p12 = pneg %p3643_p11 }
  0xa9   : > { %p3651_p5 = pnand %p3650_p2, %p3644_p12 }
  0xab   : > { %3654 = shalt.err (!%p3651_p5)
}
  0xac   : > { %3358 = dma.hbm_to_vmem [thread:$0]  (!%p4164_p6), %s4927_s10, 512, %s548_s2, [#allocation24], %s4898_s1, %s4898_s1, %s4900_s21  }
  0xad   : > { %s4019_s14 = smov [#allocation26]   ;;  %s4928_s12 = sld [smem:[#allocation55_spill]] }
  0xae   : > { %s573_s19 = sshll.u32 %s4019_s14, 4  ;;  %s574_s19 = int_to_ptr.vmem [resolvable:$true] %s573_s19 }
  0xb3   : > { %s3655_s24 = scalar_lea.hbm %s4928_s12, 512 }
  0xb4   : > { %p3656_p7 = scmp.ne.s32.totalorder %s4928_s12, %s3655_s24  ;;  %p3662_p1 = scmp.lt.u32.totalorder %s3655_s24, %s4928_s12 }
  0xb6   : > { %p3658_p9 = pnand %p3656_p7, %p4178_p8 }
  0xb8   : > { %p3659_p4 = pneg %p3658_p9 }
  0xba   : > { %p3664_p3 = pnand %p3662_p1, %p3659_p4 }
  0xbc   : > { %3667 = shalt.err (!%p3664_p3)
}
  0xbd   : > { %s3668_s2 = scalar_lea.vmem %s574_s19, 512  ;;  %p3676_p13 = scmp.lt.s32.totalorder %s574_s19, %s574_s19 }
  0xbe   : > { %p3669_p10 = scmp.ne.s32.totalorder %s574_s19, %s3668_s2  ;;  %p3677_p0 = scmp.lt.s32.totalorder %s3668_s2, %s3668_s2 }
  0xc0   : > { %p3671_p11 = pnand %p3669_p10, %p4178_p8  ;;  %p3678_p2 = por %p3677_p0, %p3676_p13 }
  0xc2   : > { %p3672_p12 = pneg %p3671_p11 }
  0xc4   : > { %p3679_p5 = pnand %p3678_p2, %p3672_p12 }
  0xc6   : > { %3682 = shalt.err (!%p3679_p5)
}
  0xc7   : > { %3364 = dma.hbm_to_vmem [thread:$0]  (!%p4164_p6), %s4928_s12, 512, %s574_s19, [#allocation27], %s4898_s1, %s4898_s1, %s4900_s21  }
  0xc8   : > { %s4929_s0 = sld [smem:[#allocation43_spill]] }
  0xce   : > { %s3683_s25 = scalar_lea.hbm %s4929_s0, 16 }
  0xcf   : > { %p3684_p7 = scmp.ne.s32.totalorder %s4929_s0, %s3683_s25  ;;  %p3690_p1 = scmp.lt.u32.totalorder %s3683_s25, %s4929_s0 }
  0xd1   : > { %p3686_p9 = pnand %p3684_p7, %p4178_p8 }
  0xd3   : > { %p3687_p4 = pneg %p3686_p9 }
  0xd5   : > { %p3692_p3 = pnand %p3690_p1, %p3687_p4 }
  0xd7   : > { %3695 = shalt.err (!%p3692_p3)
}
  0xd8   : > { %s4020_s3 = smov [#allocation6]   ;;  %s4021_s4 = smov [#allocation16]  }
  0xd9   : > { %3334 = dma.hbm_to_smem (!%p4164_p6), %s4929_s0, 16, %s4020_s3, [#allocation9]  }
  0xda   : > { %s483_s16 = sshll.u32 %s4021_s4, 4  ;;  %s4022_s22 = smov [#allocation19]   ;;  %s484_s16 = int_to_ptr.vmem [resolvable:$true] %s483_s16 }
  0xdb   : > { %s508_s14 = sshll.u32 %s4022_s22, 4  ;;  %s4930_s5 = sld [smem:[#allocation48_spill]]  ;;  %s509_s14 = int_to_ptr.vmem [resolvable:$true] %s508_s14 }
  0xe1   : > { %s3696_s20 = scalar_lea.hbm %s4930_s5, 128 }
  0xe2   : > { %p3697_p10 = scmp.ne.s32.totalorder %s4930_s5, %s3696_s20  ;;  %p3703_p13 = scmp.lt.u32.totalorder %s3696_s20, %s4930_s5 }
  0xe4   : > { %p3699_p11 = pnand %p3697_p10, %p4178_p8 }
  0xe6   : > { %p3700_p12 = pneg %p3699_p11 }
  0xe8   : > { %p3705_p0 = pnand %p3703_p13, %p3700_p12 }
  0xea   : > { %3708 = shalt.err (!%p3705_p0)
}
  0xeb   : > { %s3709_s3 = scalar_lea.vmem %s484_s16, 128  ;;  %p3717_p9 = scmp.lt.s32.totalorder %s484_s16, %s484_s16 }
  0xec   : > { %p3710_p2 = scmp.ne.s32.totalorder %s484_s16, %s3709_s3  ;;  %p3718_p4 = scmp.lt.s32.totalorder %s3709_s3, %s3709_s3 }
  0xee   : > { %p3712_p5 = pnand %p3710_p2, %p4178_p8  ;;  %p3719_p1 = por %p3718_p4, %p3717_p9 }
  0xf0   : > { %p3713_p7 = pneg %p3712_p5 }
  0xf2   : > { %p3720_p3 = pnand %p3719_p1, %p3713_p7 }
  0xf4   : > { %3723 = shalt.err (!%p3720_p3)
}
  0xf5   : > { %3343 = dma.hbm_to_vmem [thread:$0]  (!%p4164_p6), %s4930_s5, 128, %s484_s16, [#allocation15]  }
  0xf6   : > { %s4931_s7 = sld [smem:[#allocation50_spill]] }
  0xfc   : > { %s3724_s28 = scalar_lea.hbm %s4931_s7, 512 }
  0xfd   : > { %p3725_p10 = scmp.ne.s32.totalorder %s4931_s7, %s3724_s28  ;;  %p3731_p13 = scmp.lt.u32.totalorder %s3724_s28, %s4931_s7 }
  0xff   : > { %p3727_p11 = pnand %p3725_p10, %p4178_p8 }
 0x101   : > { %p3728_p12 = pneg %p3727_p11 }
 0x103   : > { %p3733_p0 = pnand %p3731_p13, %p3728_p12 }
 0x105   : > { %3736 = shalt.err (!%p3733_p0)
}
 0x106   : > { %s3737_s19 = scalar_lea.vmem %s509_s14, 512  ;;  %p3745_p9 = scmp.lt.s32.totalorder %s509_s14, %s509_s14 }
 0x107   : > { %p3738_p2 = scmp.ne.s32.totalorder %s509_s14, %s3737_s19  ;;  %p3746_p4 = scmp.lt.s32.totalorder %s3737_s19, %s3737_s19 }
 0x109   : > { %p3740_p5 = pnand %p3738_p2, %p4178_p8  ;;  %p3747_p1 = por %p3746_p4, %p3745_p9 }
 0x10b   : > { %p3741_p7 = pneg %p3740_p5 }
 0x10d   : > { %p3748_p3 = pnand %p3747_p1, %p3741_p7 }
 0x10f   : > { %3751 = shalt.err (!%p3748_p3)
}
 0x110   : > { %s4932_s16 = smov 128   ;;  %s4023_s4 = smov [#allocation22]  }
 0x111   : > { %3349 = dma.hbm_to_vmem [thread:$0]  (!%p4164_p6), %s4931_s7, 512, %s509_s14, [#allocation18], %s4932_s16, %s4932_s16, %s4900_s21  }
 0x112   : > { %s534_s1 = sshll.u32 %s4023_s4, 4  ;;  %s4024_s22 = smov [#allocation25]   ;;  %s535_s1 = int_to_ptr.vmem [resolvable:$true] %s534_s1 }
 0x113   : > { %s560_s28 = sshll.u32 %s4024_s22, 4  ;;  %s4933_s9 = sld [smem:[#allocation52_spill]]  ;;  %s561_s28 = int_to_ptr.vmem [resolvable:$true] %s560_s28 }
 0x119   : > { %s3752_s25 = scalar_lea.hbm %s4933_s9, 512 }
 0x11a   : > { %p3753_p10 = scmp.ne.s32.totalorder %s4933_s9, %s3752_s25  ;;  %p3759_p13 = scmp.lt.u32.totalorder %s3752_s25, %s4933_s9 }
 0x11c   : > { %p3755_p11 = pnand %p3753_p10, %p4178_p8 }
 0x11e   : > { %p3756_p12 = pneg %p3755_p11 }
 0x120   : > { %p3761_p0 = pnand %p3759_p13, %p3756_p12 }
 0x122   : > { %3764 = shalt.err (!%p3761_p0)
}
 0x123   : > { %s3765_s14 = scalar_lea.vmem %s535_s1, 512  ;;  %p3773_p9 = scmp.lt.s32.totalorder %s535_s1, %s535_s1 }
 0x124   : > { %p3766_p2 = scmp.ne.s32.totalorder %s535_s1, %s3765_s14  ;;  %p3774_p4 = scmp.lt.s32.totalorder %s3765_s14, %s3765_s14 }
 0x126   : > { %p3768_p5 = pnand %p3766_p2, %p4178_p8  ;;  %p3775_p1 = por %p3774_p4, %p3773_p9 }
 0x128   : > { %p3769_p7 = pneg %p3768_p5 }
 0x12a   : > { %p3776_p3 = pnand %p3775_p1, %p3769_p7 }
 0x12c   : > { %3779 = shalt.err (!%p3776_p3)
}
 0x12d   : > { %3355 = dma.hbm_to_vmem [thread:$0]  (!%p4164_p6), %s4933_s9, 512, %s535_s1, [#allocation21], %s4932_s16, %s4932_s16, %s4900_s21  }
 0x12e   : > { %s4934_s11 = sld [smem:[#allocation54_spill]] }
 0x134   : > { %s3780_s24 = scalar_lea.hbm %s4934_s11, 512 }
 0x135   : > { %p3781_p10 = scmp.ne.s32.totalorder %s4934_s11, %s3780_s24  ;;  %p3787_p13 = scmp.lt.u32.totalorder %s3780_s24, %s4934_s11 }
 0x137   : > { %p3783_p11 = pnand %p3781_p10, %p4178_p8 }
 0x139   : > { %p3784_p12 = pneg %p3783_p11 }
 0x13b   : > { %p3789_p0 = pnand %p3787_p13, %p3784_p12 }
 0x13d   : > { %3792 = shalt.err (!%p3789_p0)
}
 0x13e   : > { %s3793_s3 = scalar_lea.vmem %s561_s28, 512  ;;  %p3801_p9 = scmp.lt.s32.totalorder %s561_s28, %s561_s28 }
 0x13f   : > { %p3794_p2 = scmp.ne.s32.totalorder %s561_s28, %s3793_s3  ;;  %p3802_p4 = scmp.lt.s32.totalorder %s3793_s3, %s3793_s3 }
 0x141   : > { %p3796_p5 = pnand %p3794_p2, %p4178_p8  ;;  %p3803_p1 = por %p3802_p4, %p3801_p9 }
 0x143   : > { %p3797_p7 = pneg %p3796_p5 }
 0x145   : > { %p3804_p3 = pnand %p3803_p1, %p3797_p7 }
 0x147   : > { %3807 = shalt.err (!%p3804_p3)
}
 0x148   : > { %3361 = dma.hbm_to_vmem [thread:$0]  (!%p4164_p6), %s4934_s11, 512, %s561_s28, [#allocation24], %s4932_s16, %s4932_s16, %s4900_s21  }
 0x149   : > { %s4025_s0 = smov [#allocation28]   ;;  %s3808_s24 = scalar_lea.hbm %s4887_s13, 2048 }
 0x14a   : > { %s586_s2 = sshll.u32 %s4025_s0, 4  ;;  %p3809_p10 = scmp.ne.s32.totalorder %s4887_s13, %s3808_s24  ;;  %s587_s2 = int_to_ptr.vmem [resolvable:$true] %s586_s2 }
 0x14b   : > { %p3815_p13 = scmp.lt.u32.totalorder %s3808_s24, %s4887_s13 }
 0x14c   : > { %p3811_p11 = pnand %p3809_p10, %p4178_p8 }
 0x14e   : > { %p3812_p12 = pneg %p3811_p11 }
 0x150   : > { %p3817_p0 = pnand %p3815_p13, %p3812_p12 }
 0x152   : > { %3820 = shalt.err (!%p3817_p0)
}
 0x153   : > { %s3821_s28 = scalar_lea.vmem %s587_s2, 2048  ;;  %p3829_p9 = scmp.lt.s32.totalorder %s587_s2, %s587_s2 }
 0x154   : > { %p3822_p2 = scmp.ne.s32.totalorder %s587_s2, %s3821_s28  ;;  %p3830_p4 = scmp.lt.s32.totalorder %s3821_s28, %s3821_s28 }
 0x156   : > { %p3824_p5 = pnand %p3822_p2, %p4178_p8  ;;  %p3831_p1 = por %p3830_p4, %p3829_p9 }
 0x158   : > { %p3825_p7 = pneg %p3824_p5 }
 0x15a   : > { %p3832_p3 = pnand %p3831_p1, %p3825_p7 }
 0x15c   : > { %3835 = shalt.err (!%p3832_p3)
}
 0x15d   : > { %s4935_s23 = sld [smem:[#allocation41_spill]]  ;;  %s2862_s27 = sadd.s32 4294967294, %s4010_s18  }
 0x15e   : > { %3367 = dma.hbm_to_vmem [thread:$0]  (!%p4164_p6), %s4887_s13, 2048, %s587_s2, [#allocation27], %s4932_s16, %s4932_s16, %s4900_s21  }
 0x15f   : > { %s58_s14 = sadd.s32 1, %s4006_s17  ;;  %s88_s0 = sadd.s32 1, %s3998_s15 }
 0x160   : > { %p60_p8 = scmp.ge.s32.totalorder %s58_s14, 2  ;;  %p95_p10 = scmp.ne.s32.totalorder %s3998_s15, %s3994_s30 }
 0x161   : > { %p96_p11 = scmp.eq.s32.totalorder %s4010_s18, 0  ;;  %p101_p13 = scmp.ne.s32.totalorder %s3994_s30, %s3990_s29 }
 0x162   : > { %s4973_s14 = smov (%p60_p8, %s58_s14), 0  ;;  %p424_p9 = scmp.eq.s32.totalorder %s2862_s27, 1 }
 0x163   : > { %p4429_p12 = por %p96_p11, %p95_p10  ;;  %s83_s2 = ssub.s32 %s4006_s17, %s4973_s14 }
 0x164   : > { %p418_p6 = scmp.eq.s32.totalorder %s4935_s23, 1  ;;  %p86_p0 = scmp.eq.s32.totalorder %s83_s2, 0 }
 0x165   : > { %p4937_p2 = scmp.eq.s32.totalorder %s4935_s23, 0  ;;  %p4451_p4 = por %p424_p9, %p101_p13 }
 0x166   : > { %p4444_p7 = por %p418_p6, %p95_p10  ;;  %p3391_p1 = scmp.lt.s32.totalorder %s4010_s18, 2 }
 0x167   : > { %p4440_p5 = por %p4937_p2, %p101_p13  ;;  %s600_s26 = sand.u32 1, %s3998_s15  }
 0x168   : > { %s4939_s24 = scalar_select %p4444_p7, 1, 0 }
 0x169   : > { %s4449_s20 = scalar_select %p86_p0, %s3998_s15, %s88_s0  }
 0x16a   : > { %s4940_s25 = scalar_select %p4451_p4, 1, 0 }
 0x16b   : > { %s2951_s19 = sshll.u32 %s4006_s17, 8  ;;  %s4458_s28 = sshll.u32 %s600_s26, 4 }
 0x16c   : > { %s4941_s23 = sld [smem:[#allocation44_spill]]  ;;  %s604_s27 = scalar_lea.vmem [#allocation10], %s4458_s28 }
 0x16d   : > { %s612_s0 = sshll.u32 %s604_s27, 4  ;;  %p4468_p3 = pnand %p3391_p1, %p4429_p12  ;;  %s4472_s0 = int_to_ptr.vmem [resolvable:$true] %s612_s0 }
 0x16e   : > { %s4943_s1 = sld [smem:[#allocation45_spill]]  ;;  %s4479_s7 = scalar_lea.sflag [#allocation7], %s600_s26 }
 0x16f   : > { %p3838_p10 = pneg %p4468_p3 }
 0x172   : > { %s4463_s2 = scalar_lea.hbm %s4941_s23, %s2951_s19  ;;  %s3841_s9 = scalar_lea.hbm %s4941_s23, 512 }
 0x173   : > { %s3836_s8 = scalar_lea.hbm %s4463_s2, 256  ;;  %p3842_p13 = scmp.lt.u32.totalorder %s4463_s2, %s4941_s23 }
 0x174   : > { %s4477_s6 = scalar_lea.hbm %s4943_s1, %s2951_s19  ;;  %p3837_p8 = scmp.ne.s32.totalorder %s4463_s2, %s3836_s8 }
 0x175   : > { %p3843_p6 = scmp.lt.u32.totalorder %s3841_s9, %s3836_s8  ;;  %p3845_p2 = scmp.lt.u32.totalorder %s3836_s8, %s4463_s2 }
 0x176   : > { %p3839_p11 = pnand %p3838_p10, %p3837_p8 }
 0x177   : > { %p3844_p0 = por %p3843_p6, %p3842_p13 }
 0x178   : > { %p3840_p12 = pneg %p3839_p11 }
 0x179   : > { %p3846_p9 = por %p3845_p2, %p3844_p0 }
 0x17b   : > { %p3847_p1 = pnand %p3846_p9, %p3840_p12 }
 0x17d   : > { %3850 = shalt.err (!%p3847_p1)
}
 0x17e   : > { %s3851_s5 = scalar_lea.vmem %s4472_s0, 256  ;;  %s4026_s26 = smov [#allocation10]  }
 0x17f   : > { %p3852_p8 = scmp.ne.s32.totalorder %s4472_s0, %s3851_s5  ;;  %s3856_s19 = sshll.u32 %s4026_s26, 4  ;;  %s3857_s19 = int_to_ptr.vmem [resolvable:$false] %s3856_s19 }
 0x180   : > { %s3858_s10 = scalar_lea.vmem %s3857_s19, 512  ;;  %p3859_p7 = scmp.lt.s32.totalorder %s4472_s0, %s3857_s19 }
 0x181   : > { %p3854_p11 = pnand %p3852_p8, %p3838_p10  ;;  %p3860_p13 = scmp.lt.s32.totalorder %s3858_s10, %s3851_s5 }
 0x183   : > { %p3855_p4 = pneg %p3854_p11  ;;  %p3861_p6 = por %p3860_p13, %p3859_p7 }
 0x185   : > { %p3862_p0 = pnand %p3861_p6, %p3855_p4 }
 0x187   : > { %3865 = shalt.err (!%p3862_p0)
}
 0x188   : > { %s4944_s8 = smov 8   ;;  %s626_s9 = scalar_lea.vmem [#allocation11], %s4458_s28 }
 0x189   : > { %3371 = dma.hbm_to_vmem [thread:$0]  (!%p4468_p3), %s4463_s2, 256, %s4472_s0, %s4479_s7, %s4932_s16, %s4932_s16, %s4944_s8  }
 0x18a   : > { %s636_s11 = sshll.u32 %s626_s9, 4  ;;  %s622_s3 = sand.u32 1, %s4010_s18   ;;  %s4512_s11 = int_to_ptr.vmem [resolvable:$true] %s636_s11 }
 0x18b   : > { %s4514_s4 = scalar_lea.sflag [#allocation12], %s622_s3  ;;  %s3866_s27 = scalar_lea.hbm %s4477_s6, 256 }
 0x18c   : > { %p3867_p7 = scmp.ne.s32.totalorder %s4477_s6, %s3866_s27  ;;  %s3871_s19 = scalar_lea.hbm %s4943_s1, 512 }
 0x18d   : > { %p3872_p2 = scmp.lt.u32.totalorder %s4477_s6, %s4943_s1  ;;  %p3873_p9 = scmp.lt.u32.totalorder %s3871_s19, %s3866_s27 }
 0x18e   : > { %p3869_p4 = pnand %p3867_p7, %p3838_p10  ;;  %p3875_p8 = scmp.lt.u32.totalorder %s3866_s27, %s4477_s6 }
 0x18f   : > { %p3874_p1 = por %p3873_p9, %p3872_p2 }
 0x190   : > { %p3870_p12 = pneg %p3869_p4 }
 0x191   : > { %p3876_p11 = por %p3875_p8, %p3874_p1 }
 0x193   : > { %p3877_p13 = pnand %p3876_p11, %p3870_p12 }
 0x195   : > { %3880 = shalt.err (!%p3877_p13)
}
 0x196   : > { %s3881_s7 = scalar_lea.vmem %s4512_s11, 256  ;;  %s4027_s28 = smov [#allocation11]  }
 0x197   : > { %p3882_p6 = scmp.ne.s32.totalorder %s4512_s11, %s3881_s7  ;;  %s3886_s2 = sshll.u32 %s4027_s28, 4  ;;  %s3887_s2 = int_to_ptr.vmem [resolvable:$false] %s3886_s2 }
 0x198   : > { %s3888_s12 = scalar_lea.vmem %s3887_s2, 512  ;;  %p3889_p4 = scmp.lt.s32.totalorder %s4512_s11, %s3887_s2 }
 0x199   : > { %p3884_p0 = pnand %p3882_p6, %p3838_p10  ;;  %p3890_p2 = scmp.lt.s32.totalorder %s3888_s12, %s3881_s7 }
 0x19b   : > { %p3885_p7 = pneg %p3884_p0  ;;  %p3891_p9 = por %p3890_p2, %p3889_p4 }
 0x19d   : > { %p3892_p1 = pnand %p3891_p9, %p3885_p7 }
 0x19f   : > { %3895 = shalt.err (!%p3892_p1)
}
 0x1a0   : > { %3374 = dma.hbm_to_vmem [thread:$0]  (!%p4468_p3), %s4477_s6, 256, %s4512_s11, %s4514_s4, %s4932_s16, %s4932_s16, %s4944_s8  }
 0x1a1   : > { %s4945_s0 = sld [smem:[#allocation42_spill]] }
 0x1a7   : > { %p4946_p10 = scmp.ne.s32.totalorder %s4945_s0, 0 }
 0x1a8   : > { %s4947_s9 = sld [smem:[#allocation41_spill]] (!%p4946_p10) }
 0x1a9   : > { %648 = sbr.rel (%p4946_p10) target bundleno = 3485 (0xd9d), region = 76 }
 0x1ae   : > { %p4948_p12 = scmp.eq.s32.totalorder (!%p4946_p10), %s4947_s9, 0 }
 0x1b0   : > { %3949 = dma.done.wait (%p4948_p12), [#allocation9], 16   ;;  %p4949_p8 = pmov %p4948_p12 }
 0x1b1   : > { %s4550_s3 = sand.u32 1, %s3994_s30  }
 0x1b2   : > { %3951 = vsyncadd (%p4949_p8), [#allocation9], 4294967280  ;;  %s4553_s21 = sshll.u32 %s4550_s3, 4  ;;  %s655_s27 = scalar_lea.sflag [#allocation7], %s4550_s3 }
 0x1b3   : > { %s658_s6 = scalar_lea.vmem [#allocation10], %s4553_s21 }
 0x1b4   : > { %3953 = dma.done.wait (%p4440_p5), %s655_s27, 256  }
 0x1b5   : > { %3955 = vsyncadd (%p4440_p5), %s655_s27, 4294967040  ;;  %s663_s16 = sand.u32 1, %s4947_s9   ;;  %s667_s11 = scalar_lea.vmem [#allocation11], %s4553_s21 }
 0x1b6   : > { %s664_s8 = scalar_lea.sflag [#allocation12], %s663_s16 }
 0x1b7   : > { %3957 = dma.done.wait (%p4440_p5), %s664_s8, 256  }
 0x1b8   : > { %3959 = vsyncadd (%p4440_p5), %s664_s8, 4294967040  ;;  %p4950_p3 = pmov %p4949_p8 }
 0x1ba   : > { %3961 = dma.done.wait (%p4950_p3), [#allocation12], 128   ;;  %p4951_p11 = pmov %p4950_p3 }
 0x1bb   : > { %p4952_p13 = pmov %p4950_p3 }
 0x1bc   : > { %3963 = vsyncadd (%p4951_p11), [#allocation12], 4294967168 }
 0x1bd   : > { %3965 = dma.done.wait (%p4952_p13), [#allocation15], 256   ;;  %p4953_p6 = pmov %p4950_p3 }
 0x1be   : > { %p4954_p0 = pmov %p4950_p3 }
 0x1bf   : > { %3967 = vsyncadd (%p4953_p6), [#allocation15], 4294967040 }
 0x1c0   : > { %3969 = dma.done.wait (%p4954_p0), [#allocation18], 640   ;;  %p4955_p7 = pmov %p4954_p0 }
 0x1c1   : > { %p4956_p5 = pmov %p4954_p0 }
 0x1c2   : > { %3971 = vsyncadd (%p4955_p7), [#allocation18], 4294966656 }
 0x1c3   : > { %3973 = dma.done.wait (%p4956_p5), [#allocation21], 1024   ;;  %p4957_p4 = pmov %p4954_p0 }
 0x1c4   : > { %p4958_p2 = pmov %p4954_p0 }
 0x1c5   : > { %3975 = vsyncadd (%p4957_p4), [#allocation21], 4294966272 }
 0x1c6   : > { %3977 = dma.done.wait (%p4958_p2), [#allocation24], 1024   ;;  %p4959_p9 = pmov %p4954_p0 }
 0x1c7   : > { %p4960_p1 = pmov %p4954_p0 }
 0x1c8   : > { %3979 = vsyncadd (%p4959_p9), [#allocation24], 4294966272 }
 0x1c9   : > { %3981 = dma.done.wait (%p4960_p1), [#allocation27], 2560   ;;  %p4961_p10 = pmov %p4954_p0 }
 0x1cb   : > { %3983 = vsyncadd (%p4961_p10), [#allocation27], 4294964736 }
 0x1cc   : > { %716 = sfence }
 0x1cd   : > { %v4591_v0 = vld [vmem:[%s658_s6] sm:$0xff]  ;;  %v4593_v1 = vld [vmem:[%s658_s6 + $0x8] sm:$0xff]  ;;  %vm772_vm0 = vcmask 261120   ;;  %v4028_v44 = vmov 0.0   ;;  %vm4029_vm1 = vmmov 0   ;;  %s4030_s22 = smov 16  }
 0x1ce   : > { %v886_v2 = vld [vmem:[%s667_s11] sm:$0xff]  ;;  %v778_v3 = vmul.f32 %v4591_v0, %v4591_v0  ;;  %v779_v4 = vmul.f32 %v4593_v1, %v4593_v1  ;;  %v2902_v5 = vld [vmem:[%s667_s11 + $0x8] sm:$0xff]  ;;  %3066 = vmatprep.subr.mxu1 %v4028_v44  ;;  %773 = vst.msk [vmem:[#allocation2] sm:$0xff] %vm772_vm0, %v4028_v44  ;;  %774 = vst.msk [vmem:[#allocation3] sm:$0xff] %vm772_vm0, %v4028_v44  ;;  %3068 = vmatprep.mubr.msk.f32.mxu1 %vm4029_vm1, %v4028_v44  ;;  %s4031_s4 = smov 112   ;;  %vm1092_vm2 = vcmask 130048  }
 0x1cf   : > { %v889_v6 = vmul.f32 %v886_v2, %v886_v2  ;;  %v890_v7 = vmul.f32 %v2902_v5, %v2902_v5  ;;  %v787_v12 = vld [vmem:[#allocation19] sm:$0xff]  ;;  %v788_v13 = vld [vmem:[#allocation19 + $0x8] sm:$0xff]  ;;  %v789_v15 = vld [vmem:[#allocation19 + $0x10] sm:$0xff]  ;;  %s1254_s5 = sld [smem:[#allocation6]]  ;;  %s4033_s26 = smov 8   ;;  %vm1266_vm5 = vcmask 64512  }
 0x1d0   : > { %v780_v8 = vadd.f32 %v779_v4, %v778_v3  ;;  %v3177_v14 = vpack.c.bf16 %v788_v13, %v787_v12  ;;  %v790_v16 = vld [vmem:[#allocation19 + $0x18] sm:$0xff]  ;;  %v899_v18 = vld [vmem:[#allocation20] sm:$0xff]  ;;  %v900_v19 = vld [vmem:[#allocation20 + $0x8] sm:$0xff]  ;;  %v1074_v13 = vlaneseq  ;;  %s2919_s19 = sld [smem:[#allocation6 + $0x1]]  ;;  %s4962_s10 = sld [smem:[#allocation40_spill]] }
 0x1d1   : > { %v891_v9 = vadd.f32 %v890_v7, %v889_v6  ;;  %v3181_v17 = vpack.c.bf16 %v790_v16, %v789_v15  ;;  %v3185_v20 = vpack.c.bf16 %v900_v19, %v899_v18  ;;  %v901_v23 = vld [vmem:[#allocation20 + $0x10] sm:$0xff]  ;;  %v902_v24 = vld [vmem:[#allocation20 + $0x18] sm:$0xff]  ;;  %v984_v29 = vld [vmem:[#allocation22] sm:$0xff]  ;;  %s761_s7 = scalar_lea.vmem [#allocation29], %s4553_s21  ;;  %s4963_s9 = sld [smem:[#allocation56_spill]] }
 0x1d2   : > { %v781_v10 = vsel %vm772_vm0, %v780_v8, 0.0  ;;  %3178 = vmatprep.subr.bf16.mxu0 %v3177_v14  ;;  %v3189_v28 = vpack.c.bf16 %v902_v24, %v901_v23  ;;  %v985_v30 = vld [vmem:[#allocation22 + $0x8] sm:$0xff]  ;;  %v986_v34 = vld [vmem:[#allocation22 + $0x10] sm:$0xff]  ;;  %v987_v35 = vld [vmem:[#allocation22 + $0x18] sm:$0xff]  ;;  %v1080_v15 = vand.u32 127, %v1074_v13  ;;  %s2624_s28 = sshll.u32 %s761_s7, 4  ;;  %s4816_s28 = int_to_ptr.vmem [resolvable:$true] %s2624_s28 }
 0x1d3   : > { %782 = vadd.xlane.f32.xlu0 %v781_v10  ;;  %v893_v11 = vsel %vm772_vm0, %v891_v9, 0.0  ;;  %3180 = vmatpush3.bf16.msra.mxu0 %v3177_v14  ;;  %v3193_v33 = vpack.c.bf16 %v985_v30, %v984_v29  ;;  %v3197_v37 = vpack.c.bf16 %v987_v35, %v986_v34  ;;  %v872_v38 = vld [vmem:[#allocation13] sm:$0xff]  ;;  %v873_v39 = vld [vmem:[#allocation14] sm:$0xff]  ;;  %v1063_v49 = vld [vmem:[#allocation16] sm:$0xff]  ;;  %v4032_v9 = vmov 0.0|0.0   ;;  %s2610_s21 = scalar_lea.sflag [#allocation8], %s4550_s3 }
 0x1d4   : > { %3182 = vmatprep.subr.bf16.mxu0 %v3181_v17  ;;  %v1064_v50 = vld [vmem:[#allocation17] sm:$0xff]  ;;  %v1075_v14 = vshrl.u32 %v1074_v13, 7  ;;  %s3896_s6 = scalar_lea.vmem %s4816_s28, 256  ;;  %p4964_p8 = scmp.ne.s32.totalorder %s4939_s24, 0 }
 0x1d5   : > { %v1255_v19 = vstv %s1254_s5  ;;  %p3897_p12 = scmp.ne.s32.totalorder %s4816_s28, %s3896_s6  ;;  %s4040_s16 = smov [#allocation29]  }
 0x1d6   : > { %v4652_v16 = vsub.s32 %v1075_v14, %v1080_v15  ;;  %s2953_s2 = sshll.u32 %s4962_s10, 8  ;;  %s3900_s8 = sshll.u32 %s4040_s16, 4  ;;  %s3901_s8 = int_to_ptr.vmem [resolvable:$false] %s3900_s8 }
 0x1d7   : > { %894 = vadd.xlane.f32.xlu0 %v893_v11  ;;  %3184 = vmatpush3.bf16.msra.mxu0 %v3181_v17  ;;  %s4822_s27 = scalar_lea.hbm %s4963_s9, %s2953_s2  ;;  %p3898_p3 = pnand %p3897_p12, %p4964_p8 }
 0x1d8   : > { %3186 = vmatprep.subr.bf16.mxu0 %v3185_v20  ;;  %v2907_v17 = vcvt.s32.f32 %v4652_v16  ;;  %vm1085_vm3 = vcmp.gt.s32.totalorder %v4652_v16, 0  ;;  %vm1084_vm4 = vcmp.ge.s32.totalorder %v4652_v16, 0  ;;  %s3902_s11 = scalar_lea.vmem %s3901_s8, 512  ;;  %p3903_p13 = scmp.lt.s32.totalorder %s4816_s28, %s3901_s8 }
 0x1d9   : > { %p3899_p11 = pneg %p3898_p3  ;;  %p3904_p6 = scmp.lt.s32.totalorder %s3902_s11, %s3896_s6 }
 0x1da   : > { %v2908_v18 = vsel %vm1085_vm3, %v2907_v17, 0.0 }
 0x1db   : > { %p3905_p0 = por %p3904_p6, %p3903_p13 }
 0x1dd   : > { %p3906_p7 = pnand %p3905_p0, %p3899_p11 }
 0x260   : > { %v783_v21 = vpop.xlane.xlu0 %782 }
 0x261   : > { %3485 = vrsqrt.f32 %v783_v21 }
 0x264   : > { %v895_v22 = vpop.xlane.xlu0 %894 }
 0x265   : > { %3487 = vrsqrt.f32 %v895_v22 }
 0x26b   : > { %v3486_v25 = vpop.eup %3485 }
 0x26c   : > { %v785_v26 = vmul.f32 %v3486_v25, %v4591_v0  ;;  %v786_v27 = vmul.f32 %v3486_v25, %v4593_v1 }
 0x26e   : > { %3036 = vmatprep.mubr.msk.f32.mxu0 %vm772_vm0, %v785_v26 }
 0x26f   : > { %v3488_v31 = vpop.eup %3487  ;;  %3037 = vmatmul.mubr.msk.f32.vlgmr.msra.gmra.mrb[0].mxu0 %vm772_vm0, %v786_v27 }
 0x270   : > { %3188 = vmatpush3.bf16.msra.mxu0 %v3185_v20  ;;  %v897_v32 = vmul.f32 %v3488_v31, %v886_v2  ;;  %v898_v36 = vmul.f32 %v3488_v31, %v2902_v5  ;;  %v1256_v20 = vmul.f32 %v2908_v18, %v1255_v19  ;;  %v1783_v19 = vld [vmem:[#allocation23] sm:$0xff] }
 0x271   : > { %3190 = vmatprep.subr.bf16.mxu0 %v3189_v28 }
 0x272   : > { %3047 = vmatprep.mubr.msk.f32.mxu0 %vm772_vm0, %v897_v32  ;;  %v1257_v21 = vmul.f32 1.442695, %v1256_v20  ;;  %v1784_v20 = vld [vmem:[#allocation23 + $0x8] sm:$0xff] }
 0x274   : > { %3192 = vmatpush3.bf16.msra.mxu0 %v3189_v28  ;;  %3489 = vpow2.f32 %v1257_v21  ;;  %v1785_v21 = vld [vmem:[#allocation23 + $0x10] sm:$0xff] }
 0x275   : > { %3194 = vmatprep.subr.bf16.mxu0 %v3193_v33 }
 0x277   : > { %3048 = vmatmul.mubr.msk.f32.vlgmr.msra.gmra.mrb[2].mxu0 %vm772_vm0, %v898_v36 }
 0x278   : > { %3196 = vmatpush3.bf16.msra.mxu0 %v3193_v33  ;;  %3058 = vmatprep.mubr.msk.f32.mxu0 %vm772_vm0, %v897_v32 }
 0x279   : > { %3198 = vmatprep.subr.bf16.mxu0 %v3197_v37 }
 0x27c   : > { %3200 = vmatpush3.bf16.msra.mxu0 %v3197_v37 }
 0x27d   : > { %3061 = vmatprep.subr.mxu0 %v4028_v44 }
 0x27e   : > { %v3490_v22 = vpop.eup %3489 }
 0x27f   : > { %3059 = vmatmul.mubr.msk.f32.vlgmr.msra.gmra.mrb[4].mxu0 %vm772_vm0, %v898_v36  ;;  %v1259_v23 = vsel %vm1084_vm4, %v3490_v22, 0.0  ;;  %v3213_v22 = vpack.c.bf16 %v1784_v20, %v1783_v19 }
 0x280   : > { %3063 = vmatprep.mubr.msk.f32.mxu0 %vm4029_vm1, %v4028_v44 }
 0x342   : > { %v3038_v40 = vpop.f32.mrb[0].mxu0 }
 0x343   : > { %v875_v41 = vmul.f32 %v3038_v40, %v873_v39  ;;  %v879_v42 = vmul.f32 %v3038_v40, %v872_v38  ;;  %v863_v43 = vpop.f32.mrb[1].mxu0 }
 0x344   : > { %v874_v45 = vmul.f32 %v872_v38, %v863_v43  ;;  %v878_v46 = vmul.f32 %v873_v39, %v863_v43 }
 0x346   : > { %v876_v47 = vsub.f32 %v874_v45, %v875_v41  ;;  %v880_v48 = vadd.f32 %v879_v42, %v878_v46  ;;  %v1576_v45 = vstv %s2919_s19 }
 0x347   : > { %v1577_v46 = vmul.f32 %v2908_v18, %v1576_v45 }
 0x348   : > { %877 = vst.msk [vmem:[#allocation4] sm:$0xff] %vm772_vm0, %v876_v47  ;;  %881 = vst.msk [vmem:[#allocation5] sm:$0xff] %vm772_vm0, %v880_v48 }
 0x349   : > { %v1578_v47 = vmul.f32 1.442695, %v1577_v46 }
 0x34a   : > { %v3049_v51 = vpop.f32.mrb[2].mxu0 }
 0x34b   : > { %v1066_v52 = vmul.f32 %v3049_v51, %v1064_v50  ;;  %v1068_v53 = vmul.f32 %v3049_v51, %v1063_v49  ;;  %v975_v54 = vpop.f32.mrb[3].mxu0  ;;  %3491 = vpow2.f32 %v1578_v47 }
 0x34c   : > { %v1065_v55 = vmul.f32 %v1063_v49, %v975_v54  ;;  %v1069_v56 = vmul.f32 %v1064_v50, %v975_v54 }
 0x34e   : > { %v4621_v57 = vadd.f32 %v1066_v52, %v1065_v55  ;;  %v4623_v58 = vsub.f32 %v1068_v53, %v1069_v56 }
 0x34f   : > { %v4631_v63 = vld [vmem:[#allocation5] sm:$0xff]  ;;  %v1071_v10 = vld [vmem:[#allocation4] sm:$0xff] }
 0x350   : > { %1101 = vrot.lane.b32.xlu1 %v4621_v57, %s4030_s22  ;;  %v1094_v59 = vsub.f32 0.0, %v4623_v58 }
 0x352   : > { %1096 = vrot.lane.b32.xlu0 %v1094_v59, %s4030_s22  ;;  %v3060_v60 = vpop.f32.mrb[4].mxu0 }
 0x353   : > { %v1268_v61 = vsub.f32 0.0, %v3060_v60  ;;  %v1054_v62 = vpop.f32.mrb[5].mxu0 }
 0x354   : > { %v3205_v2 = vpack.c.bf16 %v1054_v62, %v3060_v60  ;;  %1089 = vrot.lane.b32.xlu1 %v4631_v63, %s4030_s22 }
 0x355   : > { %v3480_v3 = vpack.i.bf16 %v1268_v61, %v1054_v62  ;;  %v3202_v4 = vpack.c.bf16 %v1268_v61, %v1054_v62  ;;  %v3492_v48 = vpop.eup %3491 }
 0x356   : > { %v1580_v53 = vsel %vm1084_vm4, %v3492_v48, 0.0 }
 0x358   : > { %1422 = vrot.lane.b32.xlu1 %v4623_v58, %s4031_s4 }
 0x3c2   : > { %v1102_v5 = vpop.permute.xlu1 %1101 }
 0x3c3   : > { %v1104_v6 = vsel %vm1092_vm2, %v4623_v58, %v1102_v5 }
 0x3c4   : > { %v1097_v7 = vpop.permute.xlu0 %1096  ;;  %3067 = vmatpush3.xpose.msk.msra.mxu1 %vm772_vm0, %v1104_v6 }
 0x3c5   : > { %v1099_v8 = vsel %vm1092_vm2, %v4621_v57, %v1097_v7  ;;  %3204 = vmatprep.subr.bf16.mxu1 %v4032_v9 }
 0x3c6   : > { %v1090_v11 = vpop.permute.xlu1 %1089  ;;  %3062 = vmatpush3.xpose.msk.msra.mxu0 %vm772_vm0, %v1099_v8 }
 0x3c7   : > { %v1093_v12 = vsel %vm1092_vm2, %v1071_v10, %v1090_v11  ;;  %3201 = vmatprep.subr.bf16.mxu0 %v4032_v9 }
 0x3c8   : > { %3069 = vmatmul.mubr.msk.f32.vlgmr.msra.gmra.mrb[0].mxu1 %vm772_vm0, %v1093_v12 }
 0x3c9   : > { %3206 = vmatpush3.bf16.msra.mxu1 %v3205_v2  ;;  %3064 = vmatmul.mubr.msk.f32.vlgmr.msra.gmra.mrb[6].mxu0 %vm772_vm0, %v1093_v12 }
 0x3ca   : > { %3203 = vmatpush3.bf16.msra.mxu0 %v3202_v4  ;;  %3075 = vmatprep.mubr.msk.f32.mxu0 %vm4029_vm1, %v4028_v44  ;;  %v1423_v30 = vpop.permute.xlu1 %1422  ;;  %v1743_v4 = vld [vmem:[#allocation2] sm:$0xff] }
 0x3cb   : > { %3082 = vmatprep.mubr.msk.f32.mxu1 %vm4029_vm1, %v4028_v44  ;;  %3090 = vmatprep.subr.mxu1 %v4028_v44  ;;  %v1425_v33 = vsel %vm1092_vm2, %v1423_v30, %v4621_v57 }
 0x3cc   : > { %3085 = vmatprep.subr.mxu0 %v4028_v44 }
 0x49b   : > { %v1250_v24 = vpop.f32.mrb[0].mxu1 }
 0x49c   : > { %v1261_v25 = vmul.f32 %v1259_v23, %v1250_v24  ;;  %v1177_v26 = vpop.f32.mrb[6].mxu0  ;;  %v3070_v27 = vpop.f32.mrb[1].mxu1 }
 0x49d   : > { %v1260_v28 = vmul.f32 %v1259_v23, %v1177_v26  ;;  %v3065_v29 = vpop.f32.mrb[7].mxu0  ;;  %v1786_v23 = vld [vmem:[#allocation23 + $0x18] sm:$0xff] }
 0x49e   : > { %1263 = vrot.lane.b32.xlu1 %v1261_v25, %s4033_s26  ;;  %v3217_v24 = vpack.c.bf16 %v1786_v23, %v1785_v21 }
 0x4a2   : > { %1413 = vrot.lane.b32.xlu1 %v1071_v10, %s4031_s4 }
 0x4a6   : > { %1417 = vrot.lane.b32.xlu1 %v4621_v57, %s4031_s4 }
 0x4aa   : > { %3481 = vrot.lane.b32.xlu1 %v3480_v3, %s4031_s4  ;;  %v1751_v3 = vld [vmem:[#allocation3] sm:$0xff] }
 0x4ae   : > { %1670 = vrot.lane.b32.xlu1 %v3060_v60, %s4031_s4 }
 0x510   : > { %v1264_v31 = vpop.permute.xlu1 %1263 }
 0x511   : > { %v1267_v32 = vsel %vm1266_vm5, %v1260_v28, %v1264_v31 }
 0x512   : > { %3076 = vmatmul.mubr.msk.f32.vlgmr.msra.gmra.mrb[8].mxu0 %vm1092_vm2, %v1267_v32  ;;  %3083 = vmatmul.mubr.msk.f32.vlgmr.msra.gmra.mrb[2].mxu1 %vm1092_vm2, %v1267_v32  ;;  %v2102_v32 = vld [vmem:[#allocation25] sm:$0xff] }
 0x513   : > { %3091 = vmatpush3.xpose.msk.msra.mxu1 %vm772_vm0, %v1425_v33  ;;  %3092 = vmatprep.mubr.msk.f32.mxu1 %vm4029_vm1, %v4028_v44  ;;  %v2103_v33 = vld [vmem:[#allocation25 + $0x8] sm:$0xff] }
 0x514   : > { %v1414_v34 = vpop.permute.xlu1 %1413  ;;  %3087 = vmatprep.mubr.msk.f32.mxu0 %vm4029_vm1, %v4028_v44  ;;  %3210 = vmatprep.subr.bf16.mxu1 %v4032_v9 }
 0x515   : > { %v1416_v35 = vsel %vm1092_vm2, %v1414_v34, %v4631_v63  ;;  %v3221_v34 = vpack.c.bf16 %v2103_v33, %v2102_v32 }
 0x516   : > { %3093 = vmatmul.mubr.msk.f32.vlgmr.msra.gmra.mrb[4].mxu1 %vm772_vm0, %v1416_v35 }
 0x517   : > { %3106 = vmatprep.mubr.msk.f32.mxu1 %vm4029_vm1, %v4028_v44 }
 0x518   : > { %v1418_v36 = vpop.permute.xlu1 %1417 }
 0x519   : > { %v1420_v37 = vsel %vm1092_vm2, %v1418_v36, %v1094_v59  ;;  %v2105_v36 = vld [vmem:[#allocation25 + $0x18] sm:$0xff] }
 0x51a   : > { %3086 = vmatpush3.xpose.msk.msra.mxu0 %vm772_vm0, %v1420_v37 }
 0x51b   : > { %3207 = vmatprep.subr.bf16.mxu0 %v4032_v9 }
 0x51c   : > { %v3482_v38 = vpop.permute.xlu1 %3481 }
 0x51d   : > { %v3484_v39 = vunpack.i.h.bf16 %v3482_v38  ;;  %v3483_v40 = vunpack.i.l.bf16 %v3482_v38  ;;  %3088 = vmatmul.mubr.msk.f32.vlgmr.msra.gmra.mrb[10].mxu0 %vm772_vm0, %v1416_v35  ;;  %v2104_v35 = vld [vmem:[#allocation25 + $0x10] sm:$0xff] }
 0x51e   : > { %3099 = vmatprep.mubr.msk.f32.mxu0 %vm4029_vm1, %v4028_v44  ;;  %v3225_v37 = vpack.c.bf16 %v2105_v36, %v2104_v35 }
 0x51f   : > { %v3208_v41 = vpack.c.bf16 %v3484_v39, %v3483_v40 }
 0x520   : > { %v1671_v42 = vpop.permute.xlu1 %1670 }
 0x521   : > { %v3211_v43 = vpack.c.bf16 %v3483_v40, %v1671_v42  ;;  %3209 = vmatpush3.bf16.msra.mxu0 %v3208_v41 }
 0x522   : > { %3214 = vmatprep.subr.bf16.mxu0 %v3213_v22 }
 0x523   : > { %3212 = vmatpush3.bf16.msra.mxu1 %v3211_v43 }
 0x524   : > { %3222 = vmatprep.subr.bf16.mxu1 %v3221_v34 }
 0x5e5   : > { %v1338_v49 = vpop.f32.mrb[8].mxu0  ;;  %v1408_v50 = vpop.f32.mrb[2].mxu1 }
 0x5e6   : > { %v3077_v51 = vpop.f32.mrb[9].mxu0  ;;  %v3084_v52 = vpop.f32.mrb[3].mxu1 }
 0x5e7   : > { %v4034_v52 = vmov 683565275  }
 0x5e9   : > { %v1571_v54 = vpop.f32.mrb[4].mxu1 }
 0x5ea   : > { %v1582_v44 = vmul.f32 %v1580_v53, %v1571_v54  ;;  %v3094_v55 = vpop.f32.mrb[5].mxu1  ;;  %v4035_v54 = vmov 2475754826  }
 0x5ec   : > { %1584 = vrot.lane.b32.xlu0 %v1582_v44, %s4033_s26 }
 0x5f0   : > { %v1498_v56 = vpop.f32.mrb[10].mxu0 }
 0x5f1   : > { %v1581_v57 = vmul.f32 %v1580_v53, %v1498_v56  ;;  %v3089_v58 = vpop.f32.mrb[11].mxu0  ;;  %v4036_v56 = vmov 2131351028  }
 0x65e   : > { %v1585_v59 = vpop.permute.xlu0 %1584 }
 0x65f   : > { %v1587_v60 = vsel %vm1266_vm5, %v1581_v57, %v1585_v59  ;;  %v4037_v59 = vmov 2102212464  }
 0x660   : > { %3100 = vmatmul.mubr.msk.f32.vlgmr.msra.gmra.mrb[12].mxu0 %vm1092_vm2, %v1587_v60  ;;  %3107 = vmatmul.mubr.msk.f32.vlgmr.msra.gmra.mrb[6].mxu1 %vm1092_vm2, %v1587_v60 }
 0x661   : > { %3216 = vmatpush3.bf16.msra.mxu0 %v3213_v22  ;;  %3224 = vmatpush3.bf16.msra.mxu1 %v3221_v34 }
 0x662   : > { %3218 = vmatprep.subr.bf16.mxu0 %v3217_v24  ;;  %3226 = vmatprep.subr.bf16.mxu1 %v3225_v37 }
 0x665   : > { %3220 = vmatpush3.bf16.msra.mxu0 %v3217_v24  ;;  %3228 = vmatpush3.bf16.msra.mxu1 %v3225_v37 }
 0x733   : > { %v1665_v61 = vpop.f32.mrb[12].mxu0  ;;  %v1739_v62 = vpop.f32.mrb[6].mxu1 }
 0x734   : > { %1753 = vrot.lane.b32.xlu0 %v1739_v62, %s4030_s22  ;;  %v3108_v63 = vpop.f32.mrb[7].mxu1  ;;  %1745 = vrot.lane.b32.xlu1 %v1665_v61, %s4030_s22  ;;  %v3101_v2 = vpop.f32.mrb[13].mxu0  ;;  %v4038_v62 = vmov 920167782  }
 0x7a6   : > { %v1754_v5 = vpop.permute.xlu0 %1753  ;;  %v1746_v6 = vpop.permute.xlu1 %1745 }
 0x7a7   : > { %v1756_v7 = vsel %vm1092_vm2, %v1408_v50, %v1754_v5  ;;  %v1748_v8 = vsel %vm1092_vm2, %v1338_v49, %v1746_v6 }
 0x7a8   : > { %v1757_v9 = vadd.f32 %v1756_v7, %v1751_v3  ;;  %v1749_v10 = vadd.f32 %v1748_v8, %v1743_v4  ;;  %v4039_v3 = vmov 1326507024  }
 0x7aa   : > { %1758 = vst.msk [vmem:[#allocation3] sm:$0xff] %vm772_vm0, %v1757_v9  ;;  %1750 = vst.msk [vmem:[#allocation2] sm:$0xff] %vm772_vm0, %v1749_v10 }
 0x7b1   : > { %v1763_v11 = vld [vmem:[#allocation2] sm:$0xff]  ;;  %v1764_v12 = vld [vmem:[#allocation3] sm:$0xff] }
 0x7b2   : > { %v1765_v13 = vmul.f32 %v1763_v11, %v1763_v11  ;;  %v1766_v14 = vmul.f32 %v1764_v12, %v1764_v12 }
 0x7b4   : > { %v1767_v15 = vadd.f32 %v1766_v14, %v1765_v13 }
 0x7b6   : > { %1773 = vrot.lane.b32.xlu1 %v1767_v15, %s4031_s4  ;;  %v1768_v16 = vsel %vm1092_vm2, %v1767_v15, 0.0 }
 0x7b7   : > { %1769 = vadd.xlane.f32.xlu0 %v1768_v16 }
 0x828   : > { %v1774_v17 = vpop.permute.xlu1 %1773 }
 0x829   : > { %v1776_v18 = vsel %vm1092_vm2, %v1774_v17, 0.0 }
 0x82a   : > { %1777 = vadd.xlane.f32.xlu1 %v1776_v18 }
 0x844   : > { %v1770_v25 = vpop.xlane.xlu0 %1769 }
 0x845   : > { %3493 = vrsqrt.f32 %v1770_v25 }
 0x84f   : > { %v3494_v27 = vpop.eup %3493 }
 0x8b7   : > { %v1778_v26 = vpop.xlane.xlu1 %1777 }
 0x8b8   : > { %3495 = vrsqrt.f32 %v1778_v26 }
 0x8c2   : > { %v3496_v28 = vpop.eup %3495 }
 0x8c3   : > { %v1780_v29 = vsel %vm1092_vm2, %v3494_v27, %v3496_v28 }
 0x8c4   : > { %v4703_v30 = vmul.f32 %v1780_v29, %v1763_v11  ;;  %v4705_v31 = vmul.f32 %v1780_v29, %v1764_v12 }
 0x8c6   : > { %3117 = vmatprep.mubr.msk.f32.mxu0 %vm772_vm0, %v4703_v30 }
 0x8c7   : > { %3118 = vmatmul.mubr.msk.f32.vlgmr.msra.gmra.mrb[14].mxu0 %vm772_vm0, %v4705_v31 }
 0x99a   : > { %v4711_v38 = vpop.f32.mrb[14].mxu0 }
 0x99b   : > { %v4714_v39 = vmul.f32 2.0, %v4711_v38  ;;  %v4716_v40 = vpop.f32.mrb[15].mxu0 }
 0x99d   : > { %v1875_v41 = vand.u32 2139095040, %v4714_v39  ;;  %v1872_v46 = vand.u32 2147483647, %v4714_v39  ;;  %vm1874_vm13 = vcmp.lt.s32.totalorder %v4714_v39, 0 }
 0x99f   : > { %v1876_v42 = vshrl.u32 %v1875_v41, 23  ;;  %v1879_v49 = vand.u32 8388607, %v1872_v46  ;;  %vm1873_vm14 = vcmp.le.f32.partialorder %v1872_v46, 0.7853982 }
 0x9a1   : > { %v2924_v43 = vadd.s32 4294967169, %v1876_v42  ;;  %v1880_v5 = vor.u32 8388608, %v1879_v49 }
 0x9a3   : > { %v1882_v45 = vadd.s32 1, %v2924_v43  ;;  %v1920_v19 = vshll.u32 %v1880_v5, 8  ;;  %v1868_v5 = vmul.f32 -2.0, %v4716_v40 }
 0x9a5   : > { %vm1883_vm6 = vcmp.gt.s32.totalorder %v1882_v45, 0 }
 0x9a6   : > { %v1884_v47 = vsel %vm1883_vm6, %v1882_v45, 0  ;;  %vm1964_vm6 = vweird.f32 %v4714_v39 }
 0x9a7   : > { %v1886_v48 = vand.u32 31, %v1884_v47  ;;  %v1885_v51 = vshrl.u32 %v1884_v47, 5 }
 0x9a9   : > { %v1887_v50 = vsub.s32 32, %v1886_v48  ;;  %v1889_v53 = vshll.u32 %v4034_v52, %v1886_v48  ;;  %v1892_v44 = vshll.u32 %v4035_v54, %v1886_v48  ;;  %v1895_v58 = vshll.u32 %v4036_v56, %v1886_v48 }
 0x9aa   : > { %v1898_v61 = vshll.u32 %v4037_v59, %v1886_v48  ;;  %v1901_v2 = vshll.u32 %v4038_v62, %v1886_v48  ;;  %vm1904_vm7 = vcmp.lt.s32.totalorder %v1885_v51, 1  ;;  %vm1907_vm8 = vcmp.lt.s32.totalorder %v1885_v51, 4 }
 0x9ab   : > { %v1890_v55 = vshrl.u32 %v4035_v54, %v1887_v50  ;;  %v1893_v57 = vshrl.u32 %v4036_v56, %v1887_v50  ;;  %v1896_v60 = vshrl.u32 %v4037_v59, %v1887_v50  ;;  %v1899_v63 = vshrl.u32 %v4038_v62, %v1887_v50 }
 0x9ac   : > { %v1902_v4 = vshrl.u32 %v4039_v3, %v1887_v50  ;;  %v1888_v14 = vshrl.u32 %v4034_v52, %v1887_v50  ;;  %vm1906_vm9 = vcmp.lt.s32.totalorder %v1885_v51, 3  ;;  %vm1905_vm10 = vcmp.lt.s32.totalorder %v1885_v51, 2 }
 0x9ad   : > { %v1891_v6 = vor.u32 %v1890_v55, %v1889_v53  ;;  %v1894_v7 = vor.u32 %v1893_v57, %v1892_v44  ;;  %v1897_v8 = vor.u32 %v1896_v60, %v1895_v58  ;;  %v1900_v9 = vor.u32 %v1899_v63, %v1898_v61 }
 0x9ae   : > { %v1903_v10 = vor.u32 %v1902_v4, %v1901_v2 }
 0x9af   : > { %v1909_v11 = vsel %vm1907_vm8, %v1897_v8, 2102212464  ;;  %v1912_v12 = vsel %vm1904_vm7, %v1891_v6, %v1894_v7  ;;  %v1916_v13 = vsel %vm1904_vm7, %v1894_v7, %v1897_v8  ;;  %v1913_v15 = vsel %vm1907_vm8, %v1900_v9, 920167782 }
 0x9b0   : > { %v1917_v16 = vsel %vm1907_vm8, %v1903_v10, 1326507024  ;;  %v1914_v17 = vsel %vm1906_vm9, %v1897_v8, %v1913_v15  ;;  %v1908_v20 = vsel %vm1904_vm7, %v1888_v14, %v1891_v6  ;;  %v1910_v21 = vsel %vm1906_vm9, %v1894_v7, %v1909_v11 }
 0x9b1   : > { %v1918_v18 = vsel %vm1906_vm9, %v1900_v9, %v1917_v16  ;;  %v1915_v22 = vsel %vm1905_vm10, %v1912_v12, %v1914_v17  ;;  %v1911_v28 = vsel %vm1905_vm10, %v1908_v20, %v1910_v21  ;;  %v1869_v9 = vmul.f32 1.442695, %v1868_v5  ;;  %v2204_v5 = vld [vmem:[#allocation26 + $0x18] sm:$0xff] }
 0x9b2   : > { %v1919_v23 = vsel %vm1905_vm10, %v1916_v13, %v1918_v18  ;;  %v4736_v26 = vmul.u32.u64.low %v1920_v19, %v1915_v22  ;;  %v4737_v27 = vmul.u32.u64.high %v1920_v19, %v1915_v22, %v4736_v26  ;;  %v1927_v32 = vmul.u32 %v1920_v19, %v1911_v28 }
 0x9b3   : > { %v4733_v24 = vmul.u32.u64.low %v1920_v19, %v1919_v23  ;;  %v4734_v25 = vmul.u32.u64.high %v1920_v19, %v1919_v23, %v4733_v24 }
 0x9b4   : > { %v1930_v29 = vadd.s32 1, %v4737_v27 }
 0x9b5   : > { %vm1929_vm11 = vc.u32 %v4734_v25, %v4736_v26  ;;  %v1928_v49 = vadd.s32 %v4736_v26, %v4734_v25 }
 0x9b6   : > { %v1931_v33 = vsel %vm1929_vm11, %v1930_v29, %v4737_v27 }
 0x9b7   : > { %v1932_v34 = vadd.s32 %v1931_v33, %v1927_v32 }
 0x9b9   : > { %v1933_v35 = vadd.s32 536870912, %v1932_v34 }
 0x9bb   : > { %v1934_v36 = vshrl.u32 %v1933_v35, 30 }
 0x9bd   : > { %v1935_v37 = vshll.u32 %v1934_v36, 30  ;;  %v1958_v4 = vsub.s32 4, %v1934_v36 }
 0x9bf   : > { %v1936_v41 = vsub.s32 %v1932_v34, %v1935_v37  ;;  %v1959_v8 = vsel %vm1874_vm13, %v1958_v4, %v1934_v36 }
 0x9c0   : > { %v1961_v11 = vsel %vm1873_vm14, 0, %v1959_v8 }
 0x9c1   : > { %v1938_v42 = vsub.s32 0, %v1936_v41  ;;  %v2071_v12 = vadd.s32 3, %v1961_v11  ;;  %v1965_v13 = vand.u32 3, %v1961_v11  ;;  %v2514_v11 = vld [vmem:[#allocation28 + $0x8] sm:$0xff] }
 0x9c3   : > { %v2925_v43 = vmin.u32 %v1938_v42, %v1936_v41  ;;  %v2072_v14 = vand.u32 3, %v2071_v12  ;;  %vm1970_vm15 = vcmp.eq.s32.totalorder %v1965_v13, 2  ;;  %vm1967_vm2 = vcmp.eq.s32.totalorder %v1965_v13, 0 }
 0x9c4   : > { %vm1966_vm4 = vcmp.lt.s32.totalorder %v1965_v13, 2  ;;  %v2515_v13 = vld [vmem:[#allocation28 + $0x10] sm:$0xff] }
 0x9c5   : > { %v1940_v45 = vclz %v2925_v43  ;;  %vm2077_vm1 = vcmp.eq.s32.totalorder %v2072_v14, 2  ;;  %vm2074_vm3 = vcmp.eq.s32.totalorder %v2072_v14, 0  ;;  %vm2073_vm5 = vcmp.lt.s32.totalorder %v2072_v14, 2  ;;  %v2516_v14 = vld [vmem:[#allocation28 + $0x18] sm:$0xff] }
 0x9c7   : > { %v2926_v47 = vadd.s32 4294967294, %v1940_v45 }
 0x9c9   : > { %vm2927_vm12 = vcmp.lt.s32.totalorder %v2926_v47, 0 }
 0x9ca   : > { %v1943_v48 = vsel %vm2927_vm12, 0, %v2926_v47 }
 0x9cb   : > { %v1944_v50 = vsub.s32 32, %v1943_v48  ;;  %v1948_v51 = vsub.s32 4294967266, %v1943_v48  ;;  %v1945_v53 = vshll.u32 %v1936_v41, %v1943_v48 }
 0x9cd   : > { %v1946_v44 = vshrl.u32 %v1928_v49, %v1944_v50  ;;  %v1949_v55 = vadd.s32 127, %v1948_v51 }
 0x9cf   : > { %v1947_v57 = vor.u32 %v1946_v44, %v1945_v53  ;;  %v1950_v58 = vshll.u32 %v1949_v55, 23 }
 0x9d1   : > { %v1951_v60 = vor.u32 4788187, %v1950_v58  ;;  %v1954_v63 = vcvt.s32.f32 %v1947_v57 }
 0x9d3   : > { %v1952_v61 = vand.u32 2147483647, %v1951_v60 }
 0x9d5   : > { %v1955_v2 = vmul.f32 %v1954_v63, %v1952_v61  ;;  %v2201_v63 = vld [vmem:[#allocation26] sm:$0xff] }
 0x9d7   : > { %v1956_v6 = vxor.u32 2147483648, %v1955_v2 }
 0x9d9   : > { %v1957_v7 = vsel %vm1874_vm13, %v1956_v6, %v1955_v2  ;;  %v2202_v2 = vld [vmem:[#allocation26 + $0x8] sm:$0xff] }
 0x9da   : > { %v1960_v10 = vsel %vm1873_vm14, %v4714_v39, %v1957_v7  ;;  %v3229_v4 = vpack.c.bf16 %v2202_v2, %v2201_v63 }
 0x9db   : > { %3497 = vcosq.f32 %v1960_v10 }
 0x9dc   : > { %3499 = vsinq.f32 %v1960_v10  ;;  %3230 = vmatprep.subr.bf16.mxu0 %v3229_v4  ;;  %v2513_v10 = vld [vmem:[#allocation28] sm:$0xff] }
 0x9dd   : > { %3501 = vpow2.f32 %v1869_v9  ;;  %3232 = vmatpush3.bf16.msra.mxu0 %v3229_v4  ;;  %v3237_v12 = vpack.c.bf16 %v2514_v11, %v2513_v10 }
 0x9df   : > { %3238 = vmatprep.subr.bf16.mxu1 %v3237_v12 }
 0x9e5   : > { %v3498_v15 = vpop.eup %3497 }
 0x9e6   : > { %v3500_v16 = vpop.eup %3499  ;;  %v1971_v17 = vxor.u32 2147483648, %v3498_v15 }
 0x9e7   : > { %v3502_v18 = vpop.eup %3501  ;;  %v1968_v19 = vxor.u32 2147483648, %v3500_v16 }
 0x9e8   : > { %v1972_v46 = vsel %vm1970_vm15, %v1971_v17, %v3500_v16  ;;  %v2079_v20 = vsel %vm2077_vm1, %v1971_v17, %v3500_v16  ;;  %v1977_v24 = vsub.f32 0.0, %v3502_v18  ;;  %v2517_v16 = vld [vmem:[#allocation28 + $0x20] sm:$0xff]  ;;  %v2518_v17 = vld [vmem:[#allocation28 + $0x28] sm:$0xff] }
 0x9e9   : > { %v1969_v21 = vsel %vm1967_vm2, %v3498_v15, %v1968_v19  ;;  %v2076_v22 = vsel %vm2074_vm3, %v3498_v15, %v1968_v19  ;;  %v3241_v15 = vpack.c.bf16 %v2516_v14, %v2515_v13  ;;  %v2519_v19 = vld [vmem:[#allocation28 + $0x30] sm:$0xff] }
 0x9ea   : > { %v1973_v23 = vsel %vm1966_vm4, %v1969_v21, %v1972_v46  ;;  %v2080_v25 = vsel %vm2073_vm5, %v2076_v22, %v2079_v20  ;;  %v2520_v46 = vld [vmem:[#allocation28 + $0x38] sm:$0xff]  ;;  %v2521_v21 = vld [vmem:[#allocation28 + $0x40] sm:$0xff]  ;;  %v2522_v22 = vld [vmem:[#allocation28 + $0x48] sm:$0xff] }
 0x9eb   : > { %v1974_v26 = vsel %vm1964_vm6, nan, %v1973_v23  ;;  %v2081_v27 = vsel %vm1964_vm6, nan, %v2080_v25  ;;  %v3249_v20 = vpack.c.bf16 %v2520_v46, %v2519_v19  ;;  %v3253_v23 = vpack.c.bf16 %v2522_v22, %v2521_v21  ;;  %v2524_v25 = vld [vmem:[#allocation28 + $0x58] sm:$0xff] }
 0x9ec   : > { %v1975_v28 = vmul.f32 %v3502_v18, %v1974_v26  ;;  %v2082_v29 = vmul.f32 %v2081_v27, %v1977_v24  ;;  %v3245_v18 = vpack.c.bf16 %v2518_v17, %v2517_v16  ;;  %v2523_v24 = vld [vmem:[#allocation28 + $0x50] sm:$0xff]  ;;  %v2525_v27 = vld [vmem:[#allocation28 + $0x60] sm:$0xff] }
 0x9ed   : > { %v3257_v26 = vpack.c.bf16 %v2524_v25, %v2523_v24 }
 0x9ee   : > { %v1976_v32 = vadd.f32 1.0, %v1975_v28  ;;  %v2089_v33 = vmul.f32 %v4711_v38, %v2082_v29  ;;  %v2093_v34 = vmul.f32 %v2082_v29, %v4716_v40  ;;  %v2084_v36 = vmul.f32 %v2082_v29, %v2082_v29  ;;  %v2526_v28 = vld [vmem:[#allocation28 + $0x68] sm:$0xff] }
 0x9ef   : > { %v3261_v29 = vpack.c.bf16 %v2526_v28, %v2525_v27 }
 0x9f0   : > { %v2083_v35 = vmul.f32 %v1976_v32, %v1976_v32  ;;  %v2088_v37 = vmul.f32 %v1976_v32, %v4716_v40  ;;  %v2092_v41 = vmul.f32 %v4711_v38, %v1976_v32  ;;  %v2527_v32 = vld [vmem:[#allocation28 + $0x70] sm:$0xff] }
 0x9f2   : > { %v2085_v42 = vadd.f32 %v2084_v36, %v2083_v35  ;;  %v2090_v39 = vadd.f32 %v2089_v33, %v2088_v37  ;;  %v2094_v43 = vsub.f32 %v2092_v41, %v2093_v34  ;;  %v2528_v33 = vld [vmem:[#allocation28 + $0x78] sm:$0xff] }
 0x9f3   : > { %v3265_v34 = vpack.c.bf16 %v2528_v33, %v2527_v32 }
 0x9f4   : > { %3503 = vrcp.f32 %v2085_v42 }
 0x9fe   : > { %v3504_v45 = vpop.eup %3503 }
 0x9ff   : > { %v2091_v47 = vmul.f32 %v3504_v45, %v2090_v39  ;;  %v2095_v48 = vmul.f32 %v3504_v45, %v2094_v43 }
 0xa01   : > { %v2099_v49 = vmul.f32 %v2095_v48, %v4703_v30  ;;  %v2100_v50 = vmul.f32 %v2091_v47, %v4705_v31  ;;  %v2096_v51 = vmul.f32 %v2091_v47, %v4703_v30  ;;  %v2097_v53 = vmul.f32 %v2095_v48, %v4705_v31 }
 0xa03   : > { %v2101_v44 = vadd.f32 %v2100_v50, %v2099_v49  ;;  %v2098_v55 = vsub.f32 %v2096_v51, %v2097_v53 }
 0xa05   : > { %3128 = vmatprep.mubr.msk.f32.mxu1 %vm772_vm0, %v2098_v55 }
 0xa06   : > { %3129 = vmatmul.mubr.msk.f32.vlgmr.msra.gmra.mrb[8].mxu1 %vm772_vm0, %v2101_v44 }
 0xa07   : > { %3240 = vmatpush3.bf16.msra.mxu1 %v3237_v12 }
 0xa08   : > { %3242 = vmatprep.subr.bf16.mxu1 %v3241_v15 }
 0xa0b   : > { %3244 = vmatpush3.bf16.msra.mxu1 %v3241_v15 }
 0xa0c   : > { %3246 = vmatprep.subr.bf16.mxu1 %v3245_v18 }
 0xa0f   : > { %3248 = vmatpush3.bf16.msra.mxu1 %v3245_v18 }
 0xa10   : > { %3250 = vmatprep.subr.bf16.mxu1 %v3249_v20 }
 0xa13   : > { %3252 = vmatpush3.bf16.msra.mxu1 %v3249_v20 }
 0xa14   : > { %3254 = vmatprep.subr.bf16.mxu1 %v3253_v23 }
 0xa17   : > { %3256 = vmatpush3.bf16.msra.mxu1 %v3253_v23 }
 0xa18   : > { %3258 = vmatprep.subr.bf16.mxu1 %v3257_v26 }
 0xa1b   : > { %3260 = vmatpush3.bf16.msra.mxu1 %v3257_v26 }
 0xa1c   : > { %3262 = vmatprep.subr.bf16.mxu1 %v3261_v29 }
 0xa1f   : > { %3264 = vmatpush3.bf16.msra.mxu1 %v3261_v29 }
 0xa20   : > { %3266 = vmatprep.subr.bf16.mxu1 %v3265_v34 }
 0xa23   : > { %3268 = vmatpush3.bf16.msra.mxu1 %v3265_v34 }
 0xad9   : > { %v3130_v38 = vpop.f32.mrb[8].mxu1 }
 0xada   : > { %v4760_v40 = vadd.f32 %v3130_v38, %v4593_v1  ;;  %v2178_v57 = vpop.f32.mrb[9].mxu1  ;;  %v2203_v1 = vld [vmem:[#allocation26 + $0x10] sm:$0xff] }
 0xadb   : > { %v4763_v58 = vadd.f32 %v2178_v57, %v4591_v0  ;;  %v3233_v6 = vpack.c.bf16 %v2204_v5, %v2203_v1 }
 0xadc   : > { %v2193_v60 = vmul.f32 %v4760_v40, %v4760_v40 }
 0xadd   : > { %v2192_v30 = vmul.f32 %v4763_v58, %v4763_v58  ;;  %3234 = vmatprep.subr.bf16.mxu0 %v3233_v6 }
 0xade   : > { %3236 = vmatpush3.bf16.msra.mxu0 %v3233_v6 }
 0xadf   : > { %v2194_v31 = vadd.f32 %v2193_v60, %v2192_v30 }
 0xae1   : > { %v2195_v61 = vsel %vm772_vm0, %v2194_v31, 0.0 }
 0xae2   : > { %2196 = vadd.xlane.f32.xlu0 %v2195_v61 }
 0xb6f   : > { %v2197_v0 = vpop.xlane.xlu0 %2196 }
 0xb70   : > { %3505 = vrsqrt.f32 %v2197_v0 }
 0xb7a   : > { %v3506_v7 = vpop.eup %3505 }
 0xb7b   : > { %v2200_v8 = vmul.f32 %v3506_v7, %v4760_v40  ;;  %v2199_v9 = vmul.f32 %v3506_v7, %v4763_v58 }
 0xb7d   : > { %3139 = vmatprep.mubr.msk.f32.mxu0 %vm772_vm0, %v2199_v9 }
 0xb7e   : > { %3140 = vmatmul.mubr.msk.f32.vlgmr.msra.gmra.mrb[16].mxu0 %vm772_vm0, %v2200_v8 }
 0xc51   : > { %v4774_v35 = vpop.f32.mrb[16].mxu0 }
 0xc52   : > { %v2292_v36 = vand.u32 2139095040, %v4774_v35  ;;  %v4777_v37 = vpop.f32.mrb[17].mxu0  ;;  %v2289_v43 = vand.u32 2147483647, %v4774_v35  ;;  %vm2291_vm14 = vcmp.lt.s32.totalorder %v4774_v35, 0 }
 0xc54   : > { %v2293_v41 = vshrl.u32 %v2292_v36, 23  ;;  %v2296_v48 = vand.u32 8388607, %v2289_v43  ;;  %vm2290_vm15 = vcmp.le.f32.partialorder %v2289_v43, 0.7853982 }
 0xc56   : > { %v2937_v42 = vadd.s32 4294967169, %v2293_v41  ;;  %v2297_v63 = vor.u32 8388608, %v2296_v48 }
 0xc58   : > { %v2299_v39 = vadd.s32 1, %v2937_v42 }
 0xc5a   : > { %vm2300_vm7 = vcmp.gt.s32.totalorder %v2299_v39, 0 }
 0xc5b   : > { %v2301_v45 = vsel %vm2300_vm7, %v2299_v39, 0  ;;  %vm2381_vm7 = vweird.f32 %v4774_v35 }
 0xc5c   : > { %v2303_v47 = vand.u32 31, %v2301_v45  ;;  %v2302_v50 = vshrl.u32 %v2301_v45, 5 }
 0xc5e   : > { %v2304_v49 = vsub.s32 32, %v2303_v47  ;;  %v2306_v51 = vshll.u32 %v4034_v52, %v2303_v47  ;;  %v2309_v53 = vshll.u32 %v4035_v54, %v2303_v47  ;;  %v2312_v38 = vshll.u32 %v4036_v56, %v2303_v47 }
 0xc5f   : > { %v2315_v60 = vshll.u32 %v4037_v59, %v2303_v47  ;;  %v2318_v31 = vshll.u32 %v4038_v62, %v2303_v47  ;;  %vm2321_vm8 = vcmp.lt.s32.totalorder %v2302_v50, 1  ;;  %vm2324_vm9 = vcmp.lt.s32.totalorder %v2302_v50, 4 }
 0xc60   : > { %v2307_v44 = vshrl.u32 %v4035_v54, %v2304_v49  ;;  %v2310_v55 = vshrl.u32 %v4036_v56, %v2304_v49  ;;  %v2313_v57 = vshrl.u32 %v4037_v59, %v2304_v49  ;;  %v2316_v30 = vshrl.u32 %v4038_v62, %v2304_v49 }
 0xc61   : > { %v2319_v61 = vshrl.u32 %v4039_v3, %v2304_v49  ;;  %v2305_v7 = vshrl.u32 %v4034_v52, %v2304_v49  ;;  %vm2323_vm10 = vcmp.lt.s32.totalorder %v2302_v50, 3  ;;  %vm2322_vm11 = vcmp.lt.s32.totalorder %v2302_v50, 2 }
 0xc62   : > { %v2308_v2 = vor.u32 %v2307_v44, %v2306_v51  ;;  %v2311_v4 = vor.u32 %v2310_v55, %v2309_v53  ;;  %v2314_v1 = vor.u32 %v2313_v57, %v2312_v38  ;;  %v2317_v5 = vor.u32 %v2316_v30, %v2315_v60 }
 0xc63   : > { %v2320_v54 = vor.u32 %v2319_v61, %v2318_v31  ;;  %v2337_v3 = vshll.u32 %v2297_v63, 8  ;;  %v2286_v51 = vsub.f32 0.0, %v4777_v37 }
 0xc64   : > { %v2326_v6 = vsel %vm2324_vm9, %v2314_v1, 2102212464  ;;  %v2329_v56 = vsel %vm2321_vm8, %v2308_v2, %v2311_v4  ;;  %v2333_v0 = vsel %vm2321_vm8, %v2311_v4, %v2314_v1  ;;  %v2330_v59 = vsel %vm2324_vm9, %v2317_v5, 920167782 }
 0xc65   : > { %v2334_v8 = vsel %vm2324_vm9, %v2320_v54, 1326507024  ;;  %v2331_v62 = vsel %vm2323_vm10, %v2314_v1, %v2330_v59  ;;  %v2325_v10 = vsel %vm2321_vm8, %v2305_v7, %v2308_v2  ;;  %v2327_v11 = vsel %vm2323_vm10, %v2311_v4, %v2326_v6 }
 0xc66   : > { %v2335_v9 = vsel %vm2323_vm10, %v2317_v5, %v2334_v8  ;;  %v2332_v12 = vsel %vm2322_vm11, %v2329_v56, %v2331_v62  ;;  %v2328_v18 = vsel %vm2322_vm11, %v2325_v10, %v2327_v11  ;;  %v2287_v38 = vmul.f32 1.442695, %v2286_v51 }
 0xc67   : > { %v2336_v13 = vsel %vm2322_vm11, %v2333_v0, %v2335_v9  ;;  %v4796_v16 = vmul.u32.u64.low %v2337_v3, %v2332_v12  ;;  %v4797_v17 = vmul.u32.u64.high %v2337_v3, %v2332_v12, %v4796_v16  ;;  %v2344_v19 = vmul.u32 %v2337_v3, %v2328_v18 }
 0xc68   : > { %v4793_v14 = vmul.u32.u64.low %v2337_v3, %v2336_v13  ;;  %v4794_v15 = vmul.u32.u64.high %v2337_v3, %v2336_v13, %v4793_v14 }
 0xc69   : > { %v2347_v52 = vadd.s32 1, %v4797_v17 }
 0xc6a   : > { %vm2346_vm12 = vc.u32 %v4794_v15, %v4796_v16  ;;  %v2345_v32 = vadd.s32 %v4796_v16, %v4794_v15 }
 0xc6b   : > { %v2348_v46 = vsel %vm2346_vm12, %v2347_v52, %v4797_v17 }
 0xc6c   : > { %v2349_v20 = vadd.s32 %v2348_v46, %v2344_v19 }
 0xc6e   : > { %v2350_v21 = vadd.s32 536870912, %v2349_v20 }
 0xc70   : > { %v2351_v22 = vshrl.u32 %v2350_v21, 30 }
 0xc72   : > { %v2352_v23 = vshll.u32 %v2351_v22, 30  ;;  %v2375_v53 = vsub.s32 4, %v2351_v22 }
 0xc74   : > { %v2353_v24 = vsub.s32 %v2349_v20, %v2352_v23  ;;  %v2376_v57 = vsel %vm2291_vm14, %v2375_v53, %v2351_v22 }
 0xc75   : > { %v2378_v30 = vsel %vm2290_vm15, 0, %v2376_v57 }
 0xc76   : > { %v2355_v25 = vsub.s32 0, %v2353_v24  ;;  %v2488_v31 = vadd.s32 3, %v2378_v30  ;;  %v2382_v61 = vand.u32 3, %v2378_v30 }
 0xc78   : > { %v2938_v26 = vmin.u32 %v2355_v25, %v2353_v24  ;;  %v2489_v63 = vand.u32 3, %v2488_v31  ;;  %vm2387_vm1 = vcmp.eq.s32.totalorder %v2382_v61, 2  ;;  %vm2384_vm3 = vcmp.eq.s32.totalorder %v2382_v61, 0 }
 0xc79   : > { %vm2383_vm5 = vcmp.lt.s32.totalorder %v2382_v61, 2 }
 0xc7a   : > { %v2357_v27 = vclz %v2938_v26  ;;  %vm2494_vm2 = vcmp.eq.s32.totalorder %v2489_v63, 2  ;;  %vm2491_vm4 = vcmp.eq.s32.totalorder %v2489_v63, 0  ;;  %vm2490_vm6 = vcmp.lt.s32.totalorder %v2489_v63, 2 }
 0xc7c   : > { %v2939_v28 = vadd.s32 4294967294, %v2357_v27 }
 0xc7e   : > { %vm2940_vm13 = vcmp.lt.s32.totalorder %v2939_v28, 0 }
 0xc7f   : > { %v2360_v29 = vsel %vm2940_vm13, 0, %v2939_v28 }
 0xc80   : > { %v2361_v33 = vsub.s32 32, %v2360_v29  ;;  %v2365_v34 = vsub.s32 4294967266, %v2360_v29  ;;  %v2362_v36 = vshll.u32 %v2353_v24, %v2360_v29 }
 0xc82   : > { %v2363_v41 = vshrl.u32 %v2345_v32, %v2361_v33  ;;  %v2366_v42 = vadd.s32 127, %v2365_v34 }
 0xc84   : > { %v2364_v39 = vor.u32 %v2363_v41, %v2362_v36  ;;  %v2367_v45 = vshll.u32 %v2366_v42, 23 }
 0xc86   : > { %v2368_v47 = vor.u32 4788187, %v2367_v45  ;;  %v2371_v49 = vcvt.s32.f32 %v2364_v39 }
 0xc88   : > { %v2369_v48 = vand.u32 2147483647, %v2368_v47 }
 0xc8a   : > { %v2372_v50 = vmul.f32 %v2371_v49, %v2369_v48 }
 0xc8c   : > { %v2373_v44 = vxor.u32 2147483648, %v2372_v50 }
 0xc8e   : > { %v2374_v55 = vsel %vm2291_vm14, %v2373_v44, %v2372_v50 }
 0xc8f   : > { %v2377_v60 = vsel %vm2290_vm15, %v4774_v35, %v2374_v55 }
 0xc90   : > { %3507 = vcosq.f32 %v2377_v60 }
 0xc91   : > { %3509 = vsinq.f32 %v2377_v60 }
 0xc92   : > { %3511 = vpow2.f32 %v2287_v38 }
 0xc9a   : > { %v3508_v2 = vpop.eup %3507 }
 0xc9b   : > { %v3510_v4 = vpop.eup %3509  ;;  %v2388_v1 = vxor.u32 2147483648, %v3508_v2 }
 0xc9c   : > { %v3512_v5 = vpop.eup %3511  ;;  %v2385_v54 = vxor.u32 2147483648, %v3510_v4 }
 0xc9d   : > { %v2389_v43 = vsel %vm2387_vm1, %v2388_v1, %v3510_v4  ;;  %v2496_v6 = vsel %vm2494_vm2, %v2388_v1, %v3510_v4  ;;  %v2394_v59 = vsub.f32 0.0, %v3512_v5 }
 0xc9e   : > { %v2386_v56 = vsel %vm2384_vm3, %v3508_v2, %v2385_v54  ;;  %v2493_v0 = vsel %vm2491_vm4, %v3508_v2, %v2385_v54 }
 0xc9f   : > { %v2390_v7 = vsel %vm2383_vm5, %v2386_v56, %v2389_v43  ;;  %v2497_v8 = vsel %vm2490_vm6, %v2493_v0, %v2496_v6 }
 0xca0   : > { %v2391_v62 = vsel %vm2381_vm7, nan, %v2390_v7  ;;  %v2498_v9 = vsel %vm2381_vm7, nan, %v2497_v8 }
 0xca1   : > { %v2392_v3 = vmul.f32 %v3512_v5, %v2391_v62  ;;  %v2499_v10 = vmul.f32 %v2498_v9, %v2394_v59 }
 0xca3   : > { %v2393_v11 = vadd.f32 1.0, %v2392_v3  ;;  %v2506_v12 = vmul.f32 %v4774_v35, %v2499_v10  ;;  %v2510_v13 = vmul.f32 %v2499_v10, %v4777_v37  ;;  %v2501_v15 = vmul.f32 %v2499_v10, %v2499_v10 }
 0xca5   : > { %v2500_v14 = vmul.f32 %v2393_v11, %v2393_v11  ;;  %v2505_v16 = vmul.f32 %v2393_v11, %v4777_v37  ;;  %v2509_v17 = vmul.f32 %v4774_v35, %v2393_v11 }
 0xca7   : > { %v2502_v18 = vadd.f32 %v2501_v15, %v2500_v14  ;;  %v2507_v52 = vadd.f32 %v2506_v12, %v2505_v16  ;;  %v2511_v19 = vsub.f32 %v2509_v17, %v2510_v13 }
 0xca9   : > { %3513 = vrcp.f32 %v2502_v18 }
 0xcb3   : > { %v3514_v46 = vpop.eup %3513 }
 0xcb4   : > { %v2512_v20 = vmul.f32 %v3514_v46, %v2511_v19  ;;  %v2508_v21 = vmul.f32 %v3514_v46, %v2507_v52 }
 0xcb6   : > { %3174 = vmatprep.mubr.f32.mxu1 %v2508_v21 }
 0xcb7   : > { %3175 = vmatmul.mubr.f32.vlgmr.msra.gmra.mrb[10].mxu1 %v2512_v20 }
 0xd8a   : > { %v3176_v22 = vpop.f32.mrb[10].mxu1 }
 0xd8b   : > { %v2605_v23 = vadd.f32 %v3176_v22, %v4760_v40  ;;  %v2595_v35 = vpop.f32.mrb[11].mxu1 }
 0xd8c   : > { %v2604_v37 = vadd.f32 %v2595_v35, %v4763_v58 }
 0xd8d   : > { %2945 = vst.msk [vmem:[%s761_s7 + $0x8] sm:$0xff] %vm772_vm0, %v2605_v23 }
 0xd8e   : > { %2606 = vst.msk [vmem:[%s761_s7] sm:$0xff] %vm772_vm0, %v2604_v37 }
 0xd8f   : > { %3909 = shalt.err (!%p3906_p7)
}
 0xd90   : > { %s3910_s22 = scalar_lea.hbm %s4822_s27, 256  ;;  %s3914_s19 = scalar_lea.hbm %s4963_s9, 512 }
 0xd91   : > { %p3911_p5 = scmp.ne.s32.totalorder %s4822_s27, %s3910_s22  ;;  %p3915_p9 = scmp.lt.u32.totalorder %s4822_s27, %s4963_s9 }
 0xd92   : > { %p3916_p1 = scmp.lt.u32.totalorder %s3914_s19, %s3910_s22  ;;  %p3918_p12 = scmp.lt.u32.totalorder %s3910_s22, %s4822_s27 }
 0xd93   : > { %p3912_p4 = pnand %p3911_p5, %p4964_p8 }
 0xd94   : > { %p3917_p10 = por %p3916_p1, %p3915_p9 }
 0xd95   : > { %p3913_p2 = pneg %p3912_p4 }
 0xd96   : > { %p3919_p3 = por %p3918_p12, %p3917_p10 }
 0xd98   : > { %p3920_p11 = pnand %p3919_p3, %p3913_p2 }
 0xd9a   : > { %3923 = shalt.err (!%p3920_p11)
}
 0xd9b   : > { %s4041_s2 = smov 128  }
 0xd9c   : > { %3329 = dma.vmem_to_hbm [thread:$0]  (%p4964_p8), %s4816_s28, 256, %s4822_s27, %s2610_s21, %s4041_s2, %s4041_s2, %s4033_s26  }
 0xd9d PF: > { %s2639_s12 = sand.u32 1, %s3990_s29   ;;  %p4965_p13 = scmp.ne.s32.totalorder %s4940_s25, 0 }
 0xd9e   : > { %p4966_p6 = scmp.ge.s32.totalorder %s4010_s18, 2  ;;  %s2640_s0 = scalar_lea.sflag [#allocation8], %s2639_s12 }
 0xda0   : > { %p3376_p0 = pnand %p4966_p6, %p4965_p13 }
 0xda2   : > { %3985 = dma.done.wait (!%p3376_p0), %s2640_s0, 256  }
 0xda3   : > { %3987 = vsyncadd (!%p3376_p0), %s2640_s0, 4294967040  ;;  %s39_s18 = sadd.s32 1, %s4010_s18   ;;  %s4967_s29 = smov %s3994_s30 }
 0xda4   : > { %p36_p7 = scmp.ge.s32.totalorder %s39_s18, 4   ;;  %s4968_s30 = smov %s3998_s15 }
 0xda5   : > { %s4969_s15 = smov %s4449_s20  ;;  %s4970_s16 = smov %s4006_s17 }
 0xda6   : > { %s4971_s17 = smov %s4973_s14  ;;  %38 = sbr.rel (!%p36_p7) target bundleno = 29 (0x1d), region = 203 }
 0xdad   :  { %2645 = vsyncpa [#allocation7], 1 }
 0xdae   :  { %2647 = vsyncpa [#allocation7 + $0x1], 1 }
 0xdaf   :  { %2648 = vsyncpa [#allocation12], 1 }
 0xdb0   :  { %2650 = vsyncpa [#allocation12 + $0x1], 1 }
 0xdb1   :  { %2651 = vsyncpa [#allocation15], 1 }
 0xdb2   :  { %2652 = vsyncpa [#allocation18], 1 }
 0xdb3   :  { %2653 = vsyncpa [#allocation21], 1 }
 0xdb4   :  { %2654 = vsyncpa [#allocation24], 1 }
 0xdb5   :  { %2655 = vsyncpa [#allocation27], 1 }
 0xdb6   :  { %2656 = vsyncpa [#allocation8], 1 }
 0xdb7   :  { %2658 = vsyncpa [#allocation8 + $0x1], 1 }
 0xdb8   :  { %2659 = vsyncpa [#allocation9], 1 }
 0xdb9   :  { %2661 = vsyncpa [#allocation9 + $0x1], 1 }

</bundles_post_ra>
